<compile_context>
chip_gen: v7x
topology: tpu7x:2x2x1
jax: 0.10.0
libtpu: 0.0.40
codegen_flags: <defaults>
</compile_context>

<pallas_src>
import jax
import jax.numpy as jnp
import numpy as np
from jax.experimental import pallas as pl
from jax.experimental.pallas import tpu as pltpu


def pam_module_forward(x, params):
    B, C, H, W = x.shape
    N = H * W
    if C != N:
        raise ValueError(
            "PAM_Module.forward multiplies proj_value (B,C,HW) elementwise with "
            "attention^T (B,HW,HW); this only broadcasts when C == H*W "
            f"(got C={C}, H*W={N}).")

    C8 = params["query_conv_w"].shape[0]
    R = 2 * C8 + C                                                  # stacked QKV rows

    # --- wrapper-side weight prep (one-time, constant) -------------------------------
    wq = params["query_conv_w"].reshape(C8, C).astype(jnp.float32)
    wk = params["key_conv_w"].reshape(C8, C).astype(jnp.float32)
    wv = params["value_conv_w"].reshape(C, C).astype(jnp.float32)
    w_qkv = jnp.concatenate([wq, wk, wv], axis=0).astype(jnp.bfloat16)       # (R, C)
    b_qkv = jnp.concatenate(
        [params["query_conv_b"].reshape(-1),
         params["key_conv_b"].reshape(-1),
         params["value_conv_b"].reshape(-1)], axis=0
    ).reshape(R, 1).astype(jnp.float32)                                      # (R, 1)
    gamma = params["gamma"].reshape(1).astype(jnp.float32)

    x_flat = x.reshape(B, C, N).astype(jnp.float32)                          # lane-dense

    # --- kernel: one fused step per image ---------------------------------------------
    def kernel(x_ref, w_ref, b_ref, gamma_ref, out_ref):
        x_f32 = x_ref[...]                                       # (C, N) f32
        # Fused 1x1-conv projections: one (R, C) x (C, N) bf16 matmul, f32 accumulate.
        qkv = jnp.dot(w_ref[...], x_f32.astype(jnp.bfloat16),
                      preferred_element_type=jnp.float32) + b_ref[...]       # (R, N)
        q = qkv[:C8, :]                                          # (C8, N)
        k = qkv[C8:2 * C8, :]                                    # (C8, N)
        v = qkv[2 * C8:, :]                                      # (C,  N)

        # energy^T[key_pos, query_pos] = sum_d k[d, key] * q[d, query]
        # (contract dim 0 on both operands -> no x.T and no attention.T needed).
        # Kept in f32: this matmul feeds the softmax.
        energy_t = jax.lax.dot_general(
            k, q, (((0,), (0,)), ((), ())),
            preferred_element_type=jnp.float32)                  # (N, N)

        # softmax over key positions == axis 0 of energy_t.
        m = jnp.max(energy_t, axis=0, keepdims=True)             # (1, N)
        e = jnp.exp(energy_t - m)
        inv = pl.reciprocal(jnp.sum(e, axis=0, keepdims=True), approx=True)  # (1, N)

        # out = gamma * (proj_value * attention^T) + x, normalization folded in.
        out_ref[...] = gamma_ref[0] * (v * e * inv) + x_f32

    out_flat = pl.pallas_call(
        kernel,
        out_shape=jax.ShapeDtypeStruct((B, C, N), jnp.float32),
        grid_spec=pltpu.PrefetchScalarGridSpec(
            num_scalar_prefetch=0,
            grid=(B,),
            in_specs=[
                pl.BlockSpec((None, C, N), lambda b: (b, 0, 0)),     # x (per image)
                pl.BlockSpec((R, C), lambda b: (0, 0)),              # stacked W_qkv (bf16)
                pl.BlockSpec((R, 1), lambda b: (0, 0)),              # stacked bias (f32)
                pl.BlockSpec(memory_space=pltpu.MemorySpace.SMEM),   # gamma scalar
            ],
            out_specs=pl.BlockSpec((None, C, N), lambda b: (b, 0, 0)),
        ),
        compiler_params=pltpu.CompilerParams(
            dimension_semantics=("parallel",)),
    )(x_flat, w_qkv, b_qkv, gamma)

    return out_flat.reshape(B, C, H, W)


def pam_reference(x, params):
    """Pure-JAX f32 reference mirroring the PyTorch forward, for verification."""
    B, C, H, W = x.shape
    N = H * W
    hp = jax.lax.Precision.HIGHEST
    xf = x.reshape(B, C, N).astype(jnp.float32)
    wq = params["query_conv_w"].reshape(-1, C)
    wk = params["key_conv_w"].reshape(-1, C)
    wv = params["value_conv_w"].reshape(C, C)
    q = jnp.einsum("oc,bcn->bon", wq, xf, precision=hp) \
        + params["query_conv_b"].reshape(1, -1, 1)
    k = jnp.einsum("oc,bcn->bon", wk, xf, precision=hp) \
        + params["key_conv_b"].reshape(1, -1, 1)
    v = jnp.einsum("oc,bcn->bon", wv, xf, precision=hp) \
        + params["value_conv_b"].reshape(1, -1, 1)
    energy = jnp.einsum("bci,bcj->bij", q, k, precision=hp)           # (B, N, N)
    attention = jax.nn.softmax(energy, axis=-1)
    out = v * jnp.transpose(attention, (0, 2, 1))                     # elementwise (C == N)
    out = out.reshape(B, C, H, W)
    return params["gamma"].reshape(1, 1, 1, 1) * out + x


if __name__ == "__main__":
    key = jax.random.PRNGKey(0)
    keys = jax.random.split(key, 8)
    B, H, W = 2, 16, 16
    C = H * W            # the module's elementwise multiply requires C == H*W
    C8 = C // 8

    # PyTorch nn.Conv2d default init: kaiming-uniform, weight & bias ~ U(-1/sqrt(C), 1/sqrt(C)).
    bound = 1.0 / float(np.sqrt(C))
    u = lambda k_, s: jax.random.uniform(k_, s, jnp.float32, -bound, bound)
    params = {
        "query_conv_w": u(keys[0], (C8, C, 1, 1)),
        "query_conv_b": u(keys[1], (C8,)),
        "key_conv_w":   u(keys[2], (C8, C, 1, 1)),
        "key_conv_b":   u(keys[3], (C8,)),
        "value_conv_w": u(keys[4], (C, C, 1, 1)),
        "value_conv_b": u(keys[5], (C,)),
        # PyTorch initializes gamma to 0 (out == x exactly); use 0.5 here so the
        # attention path is actually exercised.  The gamma == 0 path is checked below.
        "gamma": jnp.asarray([0.5], jnp.float32),
    }
    x = jax.random.normal(keys[6], (B, C, H, W), jnp.float32)

    out = jax.block_until_ready(pam_module_forward(x, params))
    ref = pam_reference(x, params)
    assert out.shape == (B, C, H, W)
    # Tolerance accounts for bf16 MXU inputs on the fused projection matmul
    # (per the performance review); elementwise/softmax/residual stay in f32.
    np.testing.assert_allclose(np.asarray(out), np.asarray(ref), atol=2e-2, rtol=2e-2)

    # gamma == 0 (the module's real initialization): output must reduce to the residual.
    params0 = dict(params, gamma=jnp.zeros((1,), jnp.float32))
    out0 = jax.block_until_ready(pam_module_forward(x, params0))
    np.testing.assert_allclose(np.asarray(out0), np.asarray(x), atol=1e-6, rtol=0.0)

    print("KERNEL_OK")
</pallas_src>

<mosaic_0001>
module attributes {stable_mosaic.version = 11 : i64} {
  func.func @kernel(%arg0: i32, %arg1: memref<1x256x256xf32, #tpu.memory_space<vmem>>, %arg2: memref<320x256xbf16, #tpu.memory_space<vmem>>, %arg3: memref<320x1xf32, #tpu.memory_space<vmem>>, %arg4: memref<1xf32, #tpu.memory_space<smem>>, %arg5: memref<1x256x256xf32, #tpu.memory_space<vmem>>) attributes {dimension_semantics = [#tpu.dimension_semantics<parallel>], iteration_bounds = array<i64: 2>, scalar_prefetch = 0 : i64, scratch_operands = 0 : i64, tpu.core_type = #tpu.core_type<tc>, window_params = [{transform_indices = @transform_0, window_bounds = array<i64: 1, 256, 256>}, {pipeline_mode = #tpu.pipeline_mode<synchronous>, transform_indices = @transform_1, window_bounds = array<i64: 320, 256>}, {pipeline_mode = #tpu.pipeline_mode<synchronous>, transform_indices = @transform_2, window_bounds = array<i64: 320, 1>}, {transform_indices = @transform_3, window_bounds = array<i64: 1>}, {transform_indices = @transform_4, window_bounds = array<i64: 1, 256, 256>}]} {
    %c0 = arith.constant 0 : index
    %c0_0 = arith.constant 0 : index
    %c0_1 = arith.constant 0 : index
    %0 = vector.load %arg1[%c0, %c0_0, %c0_1] : memref<1x256x256xf32, #tpu.memory_space<vmem>>, vector<1x256x256xf32>
    %1 = vector.shape_cast %0 : vector<1x256x256xf32> to vector<256x256xf32>
    %c0_2 = arith.constant 0 : index
    %c0_3 = arith.constant 0 : index
    %2 = vector.load %arg2[%c0_2, %c0_3] : memref<320x256xbf16, #tpu.memory_space<vmem>>, vector<320x256xbf16>
    %3 = arith.truncf %1 : vector<256x256xf32> to vector<256x256xbf16>
    %cst = arith.constant dense<0.000000e+00> : vector<320x256xf32>
    %4 = tpu.matmul %2, %3, %cst {dimension_numbers = #tpu.dot_dimension_numbers<[1], [0], [0], [1], [0, 0, 1, 1], [], []>} : vector<320x256xbf16>, vector<256x256xbf16>, vector<320x256xf32> -> vector<320x256xf32>
    %c0_4 = arith.constant 0 : index
    %c0_5 = arith.constant 0 : index
    %5 = vector.load %arg3[%c0_4, %c0_5] : memref<320x1xf32, #tpu.memory_space<vmem>>, vector<320x1xf32>
    %6 = vector.broadcast %5 : vector<320x1xf32> to vector<320x256xf32>
    %7 = arith.addf %4, %6 : vector<320x256xf32>
    %8 = vector.extract_strided_slice %7 {offsets = [0, 0], sizes = [32, 256], strides = [1, 1]} : vector<320x256xf32> to vector<32x256xf32>
    %9 = vector.extract_strided_slice %7 {offsets = [32, 0], sizes = [32, 256], strides = [1, 1]} : vector<320x256xf32> to vector<32x256xf32>
    %10 = vector.extract_strided_slice %7 {offsets = [64, 0], sizes = [256, 256], strides = [1, 1]} : vector<320x256xf32> to vector<256x256xf32>
    %cst_6 = arith.constant dense<0.000000e+00> : vector<256x256xf32>
    %11 = tpu.matmul %9, %8, %cst_6 {dimension_numbers = #tpu.dot_dimension_numbers<[0], [0], [1], [1], [0, 1, 1, 1], [], []>} : vector<32x256xf32>, vector<32x256xf32>, vector<256x256xf32> -> vector<256x256xf32>
    %cst_7 = arith.constant dense<0xFF800000> : vector<256xf32>
    %12 = vector.multi_reduction <maximumf>, %11, %cst_7 [0] : vector<256x256xf32> to vector<256xf32>
    %13 = vector.shape_cast %12 : vector<256xf32> to vector<1x256xf32>
    %14 = vector.broadcast %13 : vector<1x256xf32> to vector<256x256xf32>
    %15 = arith.subf %11, %14 : vector<256x256xf32>
    %16 = math.exp %15 : vector<256x256xf32>
    %cst_8 = arith.constant dense<0.000000e+00> : vector<256xf32>
    %17 = vector.multi_reduction <add>, %16, %cst_8 [0] : vector<256x256xf32> to vector<256xf32>
    %18 = vector.shape_cast %17 : vector<256xf32> to vector<1x256xf32>
    %19 = tpu.reciprocal %18 {approx = true} : vector<1x256xf32> -> vector<1x256xf32>
    %c0_9 = arith.constant 0 : index
    %20 = memref.load %arg4[%c0_9] : memref<1xf32, #tpu.memory_space<smem>>
    %21 = arith.mulf %10, %16 : vector<256x256xf32>
    %22 = vector.broadcast %19 : vector<1x256xf32> to vector<256x256xf32>
    %23 = arith.mulf %21, %22 : vector<256x256xf32>
    %24 = vector.broadcast %20 : f32 to vector<256x256xf32>
    %25 = arith.mulf %24, %23 : vector<256x256xf32>
    %26 = arith.addf %25, %1 : vector<256x256xf32>
    %c0_10 = arith.constant 0 : index
    %c0_11 = arith.constant 0 : index
    %c0_12 = arith.constant 0 : index
    %27 = vector.load %arg5[%c0_10, %c0_11, %c0_12] : memref<1x256x256xf32, #tpu.memory_space<vmem>>, vector<1x256x256xf32>
    %28 = vector.shape_cast %27 : vector<1x256x256xf32> to vector<256x256xf32>
    %29 = vector.shape_cast %26 : vector<256x256xf32> to vector<1x256x256xf32>
    tpu.vector_store %arg5[%c0_10, %c0_11, %c0_12], %29 {strides = array<i32>} : memref<1x256x256xf32, #tpu.memory_space<vmem>>, vector<1x256x256xf32>,
    return
  }
  func.func @transform_0(%arg0: i32) -> (i32, i32, i32) {
    %c0_i32 = arith.constant 0 : i32
    %c0_i32_0 = arith.constant 0 : i32
    %c0_i32_1 = arith.constant 0 : i32
    return %arg0, %c0_i32, %c0_i32_0 : i32, i32, i32
  }
  func.func @transform_1(%arg0: i32) -> (i32, i32) {
    %c0_i32 = arith.constant 0 : i32
    %c0_i32_0 = arith.constant 0 : i32
    %c0_i32_1 = arith.constant 0 : i32
    return %c0_i32, %c0_i32_0 : i32, i32
  }
  func.func @transform_2(%arg0: i32) -> (i32, i32) {
    %c0_i32 = arith.constant 0 : i32
    %c0_i32_0 = arith.constant 0 : i32
    %c0_i32_1 = arith.constant 0 : i32
    return %c0_i32, %c0_i32_0 : i32, i32
  }
  func.func @transform_3(%arg0: i32) -> i32 {
    %c0_i32 = arith.constant 0 : i32
    %c0_i32_0 = arith.constant 0 : i32
    return %c0_i32 : i32
  }
  func.func @transform_4(%arg0: i32) -> (i32, i32, i32) {
    %c0_i32 = arith.constant 0 : i32
    %c0_i32_0 = arith.constant 0 : i32
    %c0_i32_1 = arith.constant 0 : i32
    return %arg0, %c0_i32, %c0_i32_0 : i32, i32, i32
  }
}

</mosaic_0001>

<bundles_post_ra>
// kernel: tpu_custom_call.1
= control target key start
LH: loop header
LB: loop body
LE: loop exit
PB: predicated region body
PF: predicated region fallthrough
CT: control target
= control target key end

     0   :  { %s4782_s0 = inlined_call_operand.hbm [shape: f32[2,256,256], index: 0, kind: input, shape index: {}]   ;;  %s4783_s1 = inlined_call_operand.vmem [shape: bf16[320,256], index: 1, kind: input, shape index: {}]   ;;  %s4784_s2 = inlined_call_operand.vmem [shape: f32[320,1], index: 2, kind: input, shape index: {}]   ;;  %s4785_s3 = inlined_call_operand.<no memory space> [shape: f32[1], index: 3, kind: input, shape index: {}]   ;;  %s4786_s4 = inlined_call_operand.hbm [shape: f32[2,256,256], index: 4, kind: output, shape index: {}]  }
   0x1   :  { %9 = sst [smem:[#allocation2]] %s4785_s3 }
   0x2   :  { %10 = vsyncpa [#allocation4], 0 }
   0x3   :  { %12 = vsyncpa [#allocation4 + $0x1], 0 }
   0x4   :  { %13 = vsyncpa [#allocation5], 0 }
   0x5   :  { %15 = vsyncpa [#allocation5 + $0x1], 0  ;;  %s2767_s17 = smov 0   ;;  %s2769_s18 = smov 0  }
   0x6   :  { %s2771_s19 = smov 0   ;;  %s2773_s20 = smov 0  }
   0x7 LB: > { %s2788_s3 = sadd.s32 4294967295, %s2729_s20   ;;  %s2195_s21 = sadd.s32 4294967294, %s2729_s20   ;;  %s2729_s20 = sphi %s2773_s20, %s5240_s20   ;;  %s2725_s19 = sphi %s2771_s19, %s5239_s19   ;;  %s2721_s18 = sphi %s2769_s18, %s5238_s18   ;;  %s2717_s17 = sphi %s2767_s17, %s5237_s17  }
   0x8   : > { %s2792_s22 = sadd.s32 1, %s2729_s20   ;;  %s28_s23 = sadd.s32 1, %s2725_s19 }
   0x9   : > { %s25_s24 = ssub.s32 %s2729_s20, %s2792_s22  ;;  %p35_p0 = scmp.ne.s32.totalorder %s2725_s19, %s2721_s18 }
   0xa   : > { %p26_p1 = scmp.eq.s32.totalorder %s25_s24, 0  ;;  %p36_p2 = scmp.eq.s32.totalorder %s2729_s20, 0 }
   0xb   : > { %p41_p3 = scmp.ne.s32.totalorder %s2721_s18, %s2717_s17  ;;  %p42_p4 = scmp.eq.s32.totalorder %s2788_s3, 0 }
   0xc   : > { %s2804_s25 = scalar_select %p26_p1, %s2725_s19, %s28_s23  }
   0xd   : > { %p2806_p5 = por %p36_p2, %p35_p0  ;;  %p2810_p6 = por %p42_p4, %p41_p3 }
   0xe   : > { %p128_p7 = scmp.eq.s32.totalorder %s2788_s3, 1  ;;  %p134_p8 = scmp.eq.s32.totalorder %s2195_s21, 1 }
   0xf   : > { %p2335_p10 = scmp.lt.s32.totalorder %s2729_s20, 2  ;;  %s163_s30 = sand.u32 1, %s2725_s19  }
  0x10   : > { %p2817_p11 = por %p128_p7, %p35_p0  ;;  %p2821_p12 = por %p134_p8, %p41_p3 }
  0x11   : > { %s2281_s5 = sshll.u32 %s2729_s20, 13  ;;  %s2198_s6 = sshll.u32 %s163_s30, 9 }
  0x12   : > { %s4881_s28 = scalar_select %p2817_p11, 1, 0 }
  0x13   : > { %s4882_s29 = scalar_select %p2821_p12, 1, 0 }
  0x14   : > { %s2830_s9 = scalar_lea.hbm %s4782_s0, %s2281_s5  ;;  %s167_s10 = scalar_lea.vmem [#allocation3], %s2198_s6 }
  0x15   : > { %s174_s11 = sshll.u32 %s167_s10, 4  ;;  %p2834_p13 = pnand %p2335_p10, %p2806_p5  ;;  %s2838_s11 = int_to_ptr.vmem [resolvable:$true] %s174_s11 }
  0x16   : > { %s2840_s13 = scalar_lea.sflag [#allocation4], %s163_s30  ;;  %s2633_s14 = scalar_lea.hbm %s2830_s9, 8192 }
  0x17   : > { %p2634_p0 = scmp.ne.s32.totalorder %s2830_s9, %s2633_s14  ;;  %p2635_p1 = pneg %p2834_p13 }
  0x18   : > { %s2638_s21 = scalar_lea.hbm %s4782_s0, 16384  ;;  %p2639_p4 = scmp.lt.u32.totalorder %s2830_s9, %s4782_s0 }
  0x19   : > { %p2636_p2 = pnand %p2635_p1, %p2634_p0  ;;  %p2640_p5 = scmp.lt.u32.totalorder %s2638_s21, %s2633_s14 }
  0x1a   : > { %p2642_p8 = scmp.lt.u32.totalorder %s2633_s14, %s2830_s9 }
  0x1b   : > { %p2637_p3 = pneg %p2636_p2  ;;  %p2641_p7 = por %p2640_p5, %p2639_p4 }
  0x1d   : > { %p2643_p10 = por %p2642_p8, %p2641_p7 }
  0x1f   : > { %p2644_p9 = pnand %p2643_p10, %p2637_p3 }
  0x21   : > { %2647 = shalt.err (!%p2644_p9)
}
  0x22   : > { %s2648_s26 = scalar_lea.vmem %s2838_s11, 8192  ;;  %s2731_s30 = smov [#allocation3]  }
  0x23   : > { %p2649_p0 = scmp.ne.s32.totalorder %s2838_s11, %s2648_s26  ;;  %s2653_s5 = sshll.u32 %s2731_s30, 4  ;;  %s2654_s5 = int_to_ptr.vmem [resolvable:$false] %s2653_s5 }
  0x24   : > { %s2655_s6 = scalar_lea.vmem %s2654_s5, 16384  ;;  %p2656_p11 = scmp.lt.s32.totalorder %s2838_s11, %s2654_s5 }
  0x25   : > { %p2651_p2 = pnand %p2649_p0, %p2635_p1  ;;  %p2657_p4 = scmp.lt.s32.totalorder %s2655_s6, %s2648_s26 }
  0x27   : > { %p2652_p12 = pneg %p2651_p2  ;;  %p2658_p5 = por %p2657_p4, %p2656_p11 }
  0x29   : > { %p2659_p7 = pnand %p2658_p5, %p2652_p12 }
  0x2b   : > { %2662 = shalt.err (!%p2659_p7)
}
  0x2c   : > { %s2732_s7 = smov 256   ;;  %s2733_s8 = smov 16  }
  0x2d   : > { %2330 = dma.hbm_to_vmem [thread:$0]  (!%p2834_p13), %s2830_s9, 8192, %s2838_s11, %s2840_s13, %s2732_s7, %s2732_s7, %s2733_s8  }
  0x2e   : > { %p2201_p9 = scmp.ge.s32.totalorder %s2729_s20, 1  ;;  %p182_p1 = scmp.lt.s32.totalorder %s2729_s20, 3 }
  0x30   : > { %p183_p3 = pnand %p2201_p9, %p182_p1 }
  0x32   : > { %186 = sbr.rel (%p183_p3) target bundleno = 1035 (0x40b), region = 36 }
  0x39   : > { %s2871_s10 = sand.u32 1, %s2721_s18  }
  0x3a   : > { %s2202_s14 = sshll.u32 %s2871_s10, 9  ;;  %s189_s15 = scalar_lea.sflag [#allocation4], %s2871_s10 }
  0x3b   : > { %s2877_s16 = scalar_lea.vmem [#allocation3], %s2202_s14 }
  0x3c   : > { %2708 = dma.done.wait (%p2810_p6), %s189_s15, 8192  }
  0x3d   : > { %2710 = vsyncadd (%p2810_p6), %s189_s15, 4294959104  ;;  %v2734_v0 = vmov 0   ;;  %v218_v1 = vld [vmem:[%s2877_s16 + $0x8] sm:$0xff]  ;;  %v220_v2 = vld [vmem:[%s2877_s16 + $0x18] sm:$0xff]  ;;  %vm1090_vm0 = vcmask 261120   ;;  %s1786_s5 = sld [smem:[#allocation2]] }
  0x3e   : > { %2375 = vset.pattern.permute.xlu0 %v2734_v0  ;;  %2376 = vset.pattern.permute.xlu1 %v2734_v0  ;;  %v217_v3 = vld [vmem:[%s2877_s16] sm:$0xff]  ;;  %v322_v4 = vpack.c.bf16 %v220_v2, %v218_v1  ;;  %v219_v5 = vld [vmem:[%s2877_s16 + $0x10] sm:$0xff]  ;;  %v222_v6 = vld [vmem:[%s2877_s16 + $0x28] sm:$0xff]  ;;  %s4418_s6 = scalar_lea.vmem [#allocation6], %s2202_s14  ;;  %s2282_s14 = sshll.u32 %s2788_s3, 13 }
  0x3f   : > { %v224_v7 = vld [vmem:[%s2877_s16 + $0x38] sm:$0xff]  ;;  %v321_v8 = vpack.c.bf16 %v219_v5, %v217_v3  ;;  %v221_v10 = vld [vmem:[%s2877_s16 + $0x20] sm:$0xff]  ;;  %v223_v11 = vld [vmem:[%s2877_s16 + $0x30] sm:$0xff]  ;;  %s2122_s7 = sshll.u32 %s4418_s6, 4  ;;  %s4714_s27 = scalar_lea.hbm %s4786_s4, %s2282_s14  ;;  %s4718_s7 = int_to_ptr.vmem [resolvable:$true] %s2122_s7 }
  0x40   : > { %v324_v9 = vpack.c.bf16 %v224_v7, %v222_v6  ;;  %v226_v12 = vld [vmem:[%s2877_s16 + $0x48] sm:$0xff]  ;;  %793 = vmatprep.subr.bf16.mxu0 %v322_v4  ;;  %v228_v13 = vld [vmem:[%s2877_s16 + $0x58] sm:$0xff]  ;;  %2291 = vmatprep.subr.bf16.mxu1 %v322_v4  ;;  %v323_v14 = vpack.c.bf16 %v223_v11, %v221_v10  ;;  %v225_v16 = vld [vmem:[%s2877_s16 + $0x40] sm:$0xff]  ;;  %s2109_s3 = scalar_lea.sflag [#allocation5], %s2871_s10  ;;  %s2663_s9 = scalar_lea.vmem %s4718_s7, 8192 }
  0x41   : > { %794 = vmatpush1.bf16.msra.mxu0 %v321_v8  ;;  %2307 = vmatpush1.bf16.msra.mxu1 %v321_v8  ;;  %v326_v15 = vpack.c.bf16 %v228_v13, %v226_v12  ;;  %v227_v17 = vld [vmem:[%s2877_s16 + $0x50] sm:$0xff]  ;;  %v230_v18 = vld [vmem:[%s2877_s16 + $0x68] sm:$0xff]  ;;  %v232_v19 = vld [vmem:[%s2877_s16 + $0x78] sm:$0xff]  ;;  %p2664_p6 = scmp.ne.s32.totalorder %s4718_s7, %s2663_s9  ;;  %p5234_p11 = scmp.ne.s32.totalorder %s4881_s28, 0 }
  0x42   : > { %795 = vmatprep.subr.bf16.mxu0 %v324_v9  ;;  %2292 = vmatprep.subr.bf16.mxu1 %v324_v9  ;;  %v325_v20 = vpack.c.bf16 %v227_v17, %v225_v16  ;;  %v328_v21 = vpack.c.bf16 %v232_v19, %v230_v18  ;;  %v229_v22 = vld [vmem:[%s2877_s16 + $0x60] sm:$0xff]  ;;  %v231_v23 = vld [vmem:[%s2877_s16 + $0x70] sm:$0xff]  ;;  %v234_v24 = vld [vmem:[%s2877_s16 + $0x88] sm:$0xff] }
  0x43   : > { %v236_v25 = vld [vmem:[%s2877_s16 + $0x98] sm:$0xff]  ;;  %v327_v26 = vpack.c.bf16 %v231_v23, %v229_v22  ;;  %v233_v28 = vld [vmem:[%s2877_s16 + $0x80] sm:$0xff]  ;;  %v235_v29 = vld [vmem:[%s2877_s16 + $0x90] sm:$0xff]  ;;  %p2665_p12 = pnand %p2664_p6, %p5234_p11 }
  0x44   : > { %v330_v27 = vpack.c.bf16 %v236_v25, %v234_v24  ;;  %v238_v30 = vld [vmem:[%s2877_s16 + $0xa8] sm:$0xff]  ;;  %v240_v31 = vld [vmem:[%s2877_s16 + $0xb8] sm:$0xff]  ;;  %v329_v32 = vpack.c.bf16 %v235_v29, %v233_v28  ;;  %v237_v34 = vld [vmem:[%s2877_s16 + $0xa0] sm:$0xff] }
  0x45   : > { %796 = vmatpush1.bf16.msra.mxu0 %v323_v14  ;;  %2308 = vmatpush1.bf16.msra.mxu1 %v323_v14  ;;  %v332_v33 = vpack.c.bf16 %v240_v31, %v238_v30  ;;  %v239_v35 = vld [vmem:[%s2877_s16 + $0xb0] sm:$0xff]  ;;  %v242_v36 = vld [vmem:[%s2877_s16 + $0xc8] sm:$0xff]  ;;  %v244_v37 = vld [vmem:[%s2877_s16 + $0xd8] sm:$0xff]  ;;  %p2666_p13 = pneg %p2665_p12 }
  0x46   : > { %797 = vmatprep.subr.bf16.mxu0 %v326_v15  ;;  %2293 = vmatprep.subr.bf16.mxu1 %v326_v15  ;;  %v331_v38 = vpack.c.bf16 %v239_v35, %v237_v34  ;;  %v241_v39 = vld [vmem:[%s2877_s16 + $0xc0] sm:$0xff]  ;;  %v243_v40 = vld [vmem:[%s2877_s16 + $0xd0] sm:$0xff]  ;;  %v334_v41 = vpack.c.bf16 %v244_v37, %v242_v36  ;;  %v246_v42 = vld [vmem:[%s2877_s16 + $0xe8] sm:$0xff] }
  0x47   : > { %v248_v43 = vld [vmem:[%s2877_s16 + $0xf8] sm:$0xff]  ;;  %v2379_v44 = vld [vmem:[%s4783_s1 + $0x4] ss:$8 sps:$4 sm:$0xff]   ;;  %v333_v45 = vpack.c.bf16 %v243_v40, %v241_v39  ;;  %v247_v48 = vld [vmem:[%s2877_s16 + $0xf0] sm:$0xff] }
  0x48   : > { %v245_v46 = vld [vmem:[%s2877_s16 + $0xe0] sm:$0xff]  ;;  %825 = vmatprep.mubr.bf16.mxu0 %v2379_v44  ;;  %v336_v47 = vpack.c.bf16 %v248_v43, %v246_v42  ;;  %v250_v49 = vld [vmem:[%s2877_s16 + $0x108] sm:$0xff]  ;;  %v252_v50 = vld [vmem:[%s2877_s16 + $0x118] sm:$0xff] }
  0x49   : > { %798 = vmatpush1.bf16.msra.mxu0 %v325_v20  ;;  %2309 = vmatpush1.bf16.msra.mxu1 %v325_v20  ;;  %v357_v51 = vld [vmem:[%s4784_s2 + $0x20] sm:$0xff]  ;;  %v359_v52 = vld [vmem:[%s4784_s2 + $0x30] sm:$0xff]  ;;  %v335_v53 = vpack.c.bf16 %v247_v48, %v245_v46  ;;  %v358_v56 = vld [vmem:[%s4784_s2 + $0x28] sm:$0xff]  ;;  %v338_v57 = vpack.c.bf16 %v252_v50, %v250_v49 }
  0x4a   : > { %799 = vmatprep.subr.bf16.mxu0 %v328_v21  ;;  %2294 = vmatprep.subr.bf16.mxu1 %v328_v21  ;;  %v249_v54 = vld [vmem:[%s2877_s16 + $0x100] sm:$0xff]  ;;  %v251_v55 = vld [vmem:[%s2877_s16 + $0x110] sm:$0xff]  ;;  %v360_v58 = vld [vmem:[%s4784_s2 + $0x38] sm:$0xff] }
  0x4b   : > { %415 = vperm.xlu0 %2375, %v357_v51   ;;  %425 = vperm.xlu1 %2376, %v359_v52   ;;  %v254_v59 = vld [vmem:[%s2877_s16 + $0x128] sm:$0xff]  ;;  %v256_v60 = vld [vmem:[%s2877_s16 + $0x138] sm:$0xff]  ;;  %v253_v61 = vld [vmem:[%s2877_s16 + $0x120] sm:$0xff]  ;;  %v337_v63 = vpack.c.bf16 %v251_v55, %v249_v54 }
  0x4c   : > { %v255_v62 = vld [vmem:[%s2877_s16 + $0x130] sm:$0xff]  ;;  %v258_v0 = vld [vmem:[%s2877_s16 + $0x148] sm:$0xff]  ;;  %v353_v1 = vld [vmem:[%s4784_s2] sm:$0xff]  ;;  %v340_v2 = vpack.c.bf16 %v256_v60, %v254_v59 }
  0x4d   : > { %800 = vmatpush1.bf16.msra.mxu0 %v327_v26  ;;  %2310 = vmatpush1.bf16.msra.mxu1 %v327_v26  ;;  %v354_v3 = vld [vmem:[%s4784_s2 + $0x8] sm:$0xff]  ;;  %v260_v4 = vld [vmem:[%s2877_s16 + $0x158] sm:$0xff]  ;;  %v355_v5 = vld [vmem:[%s4784_s2 + $0x10] sm:$0xff]  ;;  %v339_v9 = vpack.c.bf16 %v255_v62, %v253_v61 }
  0x4e   : > { %801 = vmatprep.subr.bf16.mxu0 %v330_v27  ;;  %2295 = vmatprep.subr.bf16.mxu1 %v330_v27  ;;  %v257_v6 = vld [vmem:[%s2877_s16 + $0x140] sm:$0xff]  ;;  %v259_v7 = vld [vmem:[%s2877_s16 + $0x150] sm:$0xff]  ;;  %v356_v8 = vld [vmem:[%s4784_s2 + $0x18] sm:$0xff]  ;;  %v342_v12 = vpack.c.bf16 %v260_v4, %v258_v0 }
  0x4f   : > { %420 = vperm.xlu0 %2375, %v358_v56   ;;  %430 = vperm.xlu1 %2376, %v360_v58   ;;  %v262_v10 = vld [vmem:[%s2877_s16 + $0x168] sm:$0xff]  ;;  %v264_v11 = vld [vmem:[%s2877_s16 + $0x178] sm:$0xff]  ;;  %v261_v13 = vld [vmem:[%s2877_s16 + $0x160] sm:$0xff]  ;;  %v341_v15 = vpack.c.bf16 %v259_v7, %v257_v6 }
  0x50   : > { %v263_v14 = vld [vmem:[%s2877_s16 + $0x170] sm:$0xff]  ;;  %v266_v16 = vld [vmem:[%s2877_s16 + $0x188] sm:$0xff]  ;;  %v344_v17 = vpack.c.bf16 %v264_v11, %v262_v10  ;;  %v268_v18 = vld [vmem:[%s2877_s16 + $0x198] sm:$0xff] }
  0x51   : > { %802 = vmatpush1.bf16.msra.mxu0 %v329_v32  ;;  %2311 = vmatpush1.bf16.msra.mxu1 %v329_v32  ;;  %v343_v19 = vpack.c.bf16 %v263_v14, %v261_v13  ;;  %v346_v20 = vpack.c.bf16 %v268_v18, %v266_v16  ;;  %v265_v21 = vld [vmem:[%s2877_s16 + $0x180] sm:$0xff]  ;;  %v267_v22 = vld [vmem:[%s2877_s16 + $0x190] sm:$0xff]  ;;  %v270_v23 = vld [vmem:[%s2877_s16 + $0x1a8] sm:$0xff] }
  0x52   : > { %803 = vmatprep.subr.bf16.mxu0 %v332_v33  ;;  %2296 = vmatprep.subr.bf16.mxu1 %v332_v33  ;;  %v272_v24 = vld [vmem:[%s2877_s16 + $0x1b8] sm:$0xff]  ;;  %v345_v25 = vpack.c.bf16 %v267_v22, %v265_v21  ;;  %v269_v27 = vld [vmem:[%s2877_s16 + $0x1a0] sm:$0xff]  ;;  %v271_v28 = vld [vmem:[%s2877_s16 + $0x1b0] sm:$0xff] }
  0x53   : > { %395 = vperm.xlu0 %2375, %v353_v1   ;;  %400 = vperm.xlu1 %2376, %v354_v3   ;;  %v348_v26 = vpack.c.bf16 %v272_v24, %v270_v23  ;;  %v274_v29 = vld [vmem:[%s2877_s16 + $0x1c8] sm:$0xff]  ;;  %v276_v30 = vld [vmem:[%s2877_s16 + $0x1d8] sm:$0xff]  ;;  %v347_v31 = vpack.c.bf16 %v271_v28, %v269_v27  ;;  %v273_v33 = vld [vmem:[%s2877_s16 + $0x1c0] sm:$0xff] }
  0x54   : > { %v350_v32 = vpack.c.bf16 %v276_v30, %v274_v29  ;;  %v275_v34 = vld [vmem:[%s2877_s16 + $0x1d0] sm:$0xff]  ;;  %v278_v35 = vld [vmem:[%s2877_s16 + $0x1e8] sm:$0xff]  ;;  %v280_v36 = vld [vmem:[%s2877_s16 + $0x1f8] sm:$0xff] }
  0x55   : > { %804 = vmatpush1.bf16.msra.mxu0 %v331_v38  ;;  %2312 = vmatpush1.bf16.msra.mxu1 %v331_v38  ;;  %v349_v37 = vpack.c.bf16 %v275_v34, %v273_v33  ;;  %v352_v38 = vpack.c.bf16 %v280_v36, %v278_v35  ;;  %v277_v39 = vld [vmem:[%s2877_s16 + $0x1e0] sm:$0xff]  ;;  %v279_v40 = vld [vmem:[%s2877_s16 + $0x1f0] sm:$0xff] }
  0x56   : > { %805 = vmatprep.subr.bf16.mxu0 %v334_v41  ;;  %2297 = vmatprep.subr.bf16.mxu1 %v334_v41  ;;  %v351_v41 = vpack.c.bf16 %v279_v40, %v277_v39  ;;  %v2377_v42 = vld [vmem:[%s4783_s1] ss:$8 sps:$4 sm:$0xff]   ;;  %v2380_v43 = vld [vmem:[%s4783_s1 + $0x14] ss:$8 sps:$4 sm:$0xff]   ;;  %v2382_v44 = vld [vmem:[%s4783_s1 + $0x10] ss:$8 sps:$4 sm:$0xff]  }
  0x57   : > { %405 = vperm.xlu0 %2375, %v355_v5   ;;  %410 = vperm.xlu1 %2376, %v356_v8   ;;  %v2385_v46 = vld [vmem:[%s4783_s1 + $0x20] ss:$8 sps:$4 sm:$0xff]   ;;  %v2388_v48 = vld [vmem:[%s4783_s1 + $0x30] ss:$8 sps:$4 sm:$0xff]   ;;  %v2389_v49 = vld [vmem:[%s4783_s1 + $0x44] ss:$8 sps:$4 sm:$0xff]  }
  0x58   : > { %v2391_v50 = vld [vmem:[%s4783_s1 + $0x40] ss:$8 sps:$4 sm:$0xff]   ;;  %v2392_v51 = vld [vmem:[%s4783_s1 + $0x54] ss:$8 sps:$4 sm:$0xff]   ;;  %v2394_v52 = vld [vmem:[%s4783_s1 + $0x50] ss:$8 sps:$4 sm:$0xff]  }
  0x59   : > { %806 = vmatpush1.bf16.msra.mxu0 %v333_v45  ;;  %2313 = vmatpush1.bf16.msra.mxu1 %v333_v45  ;;  %v2383_v45 = vld [vmem:[%s4783_s1 + $0x24] ss:$8 sps:$4 sm:$0xff]   ;;  %v2397_v54 = vld [vmem:[%s4783_s1 + $0x60] ss:$8 sps:$4 sm:$0xff]   ;;  %v2398_v55 = vld [vmem:[%s4783_s1 + $0x74] ss:$8 sps:$4 sm:$0xff]  }
  0x5a   : > { %807 = vmatprep.subr.bf16.mxu0 %v336_v47  ;;  %2298 = vmatprep.subr.bf16.mxu1 %v336_v47  ;;  %v2386_v47 = vld [vmem:[%s4783_s1 + $0x34] ss:$8 sps:$4 sm:$0xff]   ;;  %v2400_v56 = vld [vmem:[%s4783_s1 + $0x70] ss:$8 sps:$4 sm:$0xff]   ;;  %v2403_v58 = vld [vmem:[%s4783_s1 + $0x80] ss:$8 sps:$4 sm:$0xff]  }
  0x5b   : > { %v2406_v59 = vld [vmem:[%s4783_s1 + $0x124] ss:$8 sps:$4 sm:$0xff]   ;;  %v2404_v60 = vld [vmem:[%s4783_s1 + $0x120] ss:$8 sps:$4 sm:$0xff]   ;;  %v2407_v61 = vld [vmem:[%s4783_s1 + $0x94] ss:$8 sps:$4 sm:$0xff]  }
  0x5c   : > { %1005 = vmatprep.mubr.bf16.mxu1 %v2406_v59  ;;  %v2409_v62 = vld [vmem:[%s4783_s1 + $0x90] ss:$8 sps:$4 sm:$0xff]   ;;  %v2412_v0 = vld [vmem:[%s4783_s1 + $0xa0] ss:$8 sps:$4 sm:$0xff]   ;;  %v2413_v1 = vld [vmem:[%s4783_s1 + $0xb4] ss:$8 sps:$4 sm:$0xff]  }
  0x5d   : > { %808 = vmatpush1.bf16.msra.mxu0 %v335_v53  ;;  %2314 = vmatpush1.bf16.msra.mxu1 %v335_v53  ;;  %v2395_v53 = vld [vmem:[%s4783_s1 + $0x64] ss:$8 sps:$4 sm:$0xff]   ;;  %v2418_v4 = vld [vmem:[%s4783_s1 + $0xc0] ss:$8 sps:$4 sm:$0xff]   ;;  %v2419_v5 = vld [vmem:[%s4783_s1 + $0xd4] ss:$8 sps:$4 sm:$0xff]  }
  0x5e   : > { %809 = vmatprep.subr.bf16.mxu0 %v338_v57  ;;  %2299 = vmatprep.subr.bf16.mxu1 %v338_v57  ;;  %v2401_v57 = vld [vmem:[%s4783_s1 + $0x84] ss:$8 sps:$4 sm:$0xff]   ;;  %v2434_v6 = vld [vmem:[%s4783_s1 + $0x134] ss:$8 sps:$4 sm:$0xff]   ;;  %v2436_v7 = vld [vmem:[%s4783_s1 + $0x130] ss:$8 sps:$4 sm:$0xff]  }
  0x5f   : > { %v2416_v3 = vld [vmem:[%s4783_s1 + $0xc4] ss:$8 sps:$4 sm:$0xff]   ;;  %v2421_v8 = vld [vmem:[%s4783_s1 + $0xd0] ss:$8 sps:$4 sm:$0xff]   ;;  %v2424_v10 = vld [vmem:[%s4783_s1 + $0xe0] ss:$8 sps:$4 sm:$0xff]  }
  0x60   : > { %v2425_v11 = vld [vmem:[%s4783_s1 + $0xf4] ss:$8 sps:$4 sm:$0xff]   ;;  %v2428_v13 = vld [vmem:[%s4783_s1 + $0x104] ss:$8 sps:$4 sm:$0xff]   ;;  %v2430_v14 = vld [vmem:[%s4783_s1 + $0x100] ss:$8 sps:$4 sm:$0xff]  }
  0x61   : > { %810 = vmatpush1.bf16.msra.mxu0 %v337_v63  ;;  %2315 = vmatpush1.bf16.msra.mxu1 %v337_v63  ;;  %v2410_v63 = vld [vmem:[%s4783_s1 + $0xa4] ss:$8 sps:$4 sm:$0xff]   ;;  %v2433_v16 = vld [vmem:[%s4783_s1 + $0x110] ss:$8 sps:$4 sm:$0xff]  }
  0x62   : > { %811 = vmatprep.subr.bf16.mxu0 %v340_v2  ;;  %2300 = vmatprep.subr.bf16.mxu1 %v340_v2  ;;  %v2415_v2 = vld [vmem:[%s4783_s1 + $0xb0] ss:$8 sps:$4 sm:$0xff]  }
  0x65   : > { %812 = vmatpush1.bf16.msra.mxu0 %v339_v9  ;;  %2316 = vmatpush1.bf16.msra.mxu1 %v339_v9  ;;  %v2422_v9 = vld [vmem:[%s4783_s1 + $0xe4] ss:$8 sps:$4 sm:$0xff]  }
  0x66   : > { %813 = vmatprep.subr.bf16.mxu0 %v342_v12  ;;  %2301 = vmatprep.subr.bf16.mxu1 %v342_v12  ;;  %v2427_v12 = vld [vmem:[%s4783_s1 + $0xf0] ss:$8 sps:$4 sm:$0xff]  }
  0x69   : > { %814 = vmatpush1.bf16.msra.mxu0 %v341_v15  ;;  %2317 = vmatpush1.bf16.msra.mxu1 %v341_v15  ;;  %v2431_v15 = vld [vmem:[%s4783_s1 + $0x114] ss:$8 sps:$4 sm:$0xff]  }
  0x6a   : > { %815 = vmatprep.subr.bf16.mxu0 %v344_v17  ;;  %2302 = vmatprep.subr.bf16.mxu1 %v344_v17 }
  0x6d   : > { %816 = vmatpush1.bf16.msra.mxu0 %v343_v19  ;;  %2318 = vmatpush1.bf16.msra.mxu1 %v343_v19 }
  0x6e   : > { %817 = vmatprep.subr.bf16.mxu0 %v346_v20  ;;  %2303 = vmatprep.subr.bf16.mxu1 %v346_v20 }
  0x71   : > { %818 = vmatpush1.bf16.msra.mxu0 %v345_v25  ;;  %2319 = vmatpush1.bf16.msra.mxu1 %v345_v25 }
  0x72   : > { %819 = vmatprep.subr.bf16.mxu0 %v348_v26  ;;  %2304 = vmatprep.subr.bf16.mxu1 %v348_v26 }
  0x75   : > { %820 = vmatpush1.bf16.msra.mxu0 %v347_v31  ;;  %2320 = vmatpush1.bf16.msra.mxu1 %v347_v31 }
  0x76   : > { %821 = vmatprep.subr.bf16.mxu0 %v350_v32  ;;  %2305 = vmatprep.subr.bf16.mxu1 %v350_v32 }
  0x79   : > { %822 = vmatpush1.bf16.msra.mxu0 %v349_v37  ;;  %2321 = vmatpush1.bf16.msra.mxu1 %v349_v37 }
  0x7a   : > { %823 = vmatprep.subr.bf16.mxu0 %v352_v38  ;;  %2306 = vmatprep.subr.bf16.mxu1 %v352_v38 }
  0x7d   : > { %824 = vmatpush1.bf16.msra.mxu0 %v351_v41  ;;  %2322 = vmatpush1.bf16.msra.mxu1 %v351_v41 }
  0x80   : > { %826 = vmatmul.mubr.bf16.vlgmr.msra.gmra.mrb[0].mxu0 %v2377_v42  ;;  %1006 = vmatmul.mubr.bf16.vlgmr.msra.gmra.mrb[0].mxu1 %v2404_v60 }
  0x81   : > { %835 = vmatprep.mubr.bf16.mxu0 %v2380_v43  ;;  %1015 = vmatprep.mubr.bf16.mxu1 %v2434_v6 }
  0x88   : > { %836 = vmatmul.mubr.bf16.gmra.mrb[4].mxu0 %v2382_v44  ;;  %1016 = vmatmul.mubr.bf16.gmra.mrb[4].mxu1 %v2436_v7 }
  0x89   : > { %845 = vmatprep.mubr.bf16.mxu0 %v2383_v45 }
  0x90   : > { %846 = vmatmul.mubr.bf16.gmra.mrb[8].mxu0 %v2385_v46 }
  0x91   : > { %855 = vmatprep.mubr.bf16.mxu0 %v2386_v47 }
  0x98   : > { %856 = vmatmul.mubr.bf16.gmra.mrb[12].mxu0 %v2388_v48 }
  0x99   : > { %865 = vmatprep.mubr.bf16.mxu0 %v2389_v49 }
  0xa0   : > { %866 = vmatmul.mubr.bf16.gmra.mrb[16].mxu0 %v2391_v50 }
  0xa1   : > { %875 = vmatprep.mubr.bf16.mxu0 %v2392_v51  ;;  %v4788_v51 = vmov 0.0  }
  0xa2   : > { %1251 = vmatprep.mubr.f32.mxu1 %v4788_v51 }
  0xa8   : > { %876 = vmatmul.mubr.bf16.gmra.mrb[20].mxu0 %v2394_v52 }
  0xa9   : > { %885 = vmatprep.mubr.bf16.mxu0 %v2395_v53 }
  0xb0   : > { %886 = vmatmul.mubr.bf16.gmra.mrb[24].mxu0 %v2397_v54 }
  0xb1   : > { %895 = vmatprep.mubr.bf16.mxu0 %v2398_v55 }
  0xb8   : > { %896 = vmatmul.mubr.bf16.gmra.mrb[28].mxu0 %v2400_v56 }
  0xb9   : > { %905 = vmatprep.mubr.bf16.mxu0 %v2401_v57 }
  0xc0   : > { %906 = vmatmul.mubr.bf16.gmra.mrb[32].mxu0 %v2403_v58 }
  0xc1   : > { %915 = vmatprep.mubr.bf16.mxu0 %v2407_v61 }
  0xc8   : > { %916 = vmatmul.mubr.bf16.gmra.mrb[36].mxu0 %v2409_v62 }
  0xc9   : > { %925 = vmatprep.mubr.bf16.mxu0 %v2410_v63 }
  0xca   : > { %v416_v17 = vpop.permute.xlu0 %415  ;;  %v426_v18 = vpop.permute.xlu1 %425 }
  0xce   : > { %v421_v19 = vpop.permute.xlu0 %420  ;;  %v431_v20 = vpop.permute.xlu1 %430 }
  0xd0   : > { %926 = vmatmul.mubr.bf16.gmra.mrb[40].mxu0 %v2412_v0 }
  0xd1   : > { %935 = vmatprep.mubr.bf16.mxu0 %v2413_v1  ;;  %v362_v1 = vld [vmem:[%s4784_s2 + $0x48] sm:$0xff] }
  0xd2   : > { %v396_v21 = vpop.permute.xlu0 %395  ;;  %v401_v23 = vpop.permute.xlu1 %400 }
  0xd6   : > { %v406_v33 = vpop.permute.xlu0 %405  ;;  %v411_v35 = vpop.permute.xlu1 %410 }
  0xd8   : > { %936 = vmatmul.mubr.bf16.gmra.mrb[44].mxu0 %v2415_v2 }
  0xd9   : > { %945 = vmatprep.mubr.bf16.mxu0 %v2416_v3 }
  0xe0   : > { %946 = vmatmul.mubr.bf16.gmra.mrb[48].mxu0 %v2418_v4  ;;  %v364_v4 = vld [vmem:[%s4784_s2 + $0x58] sm:$0xff] }
  0xe1   : > { %955 = vmatprep.mubr.bf16.mxu0 %v2419_v5 }
  0xe8   : > { %956 = vmatmul.mubr.bf16.gmra.mrb[52].mxu0 %v2421_v8 }
  0xe9   : > { %965 = vmatprep.mubr.bf16.mxu0 %v2422_v9  ;;  %v366_v9 = vld [vmem:[%s4784_s2 + $0x68] sm:$0xff] }
  0xf0   : > { %966 = vmatmul.mubr.bf16.gmra.mrb[56].mxu0 %v2424_v10 }
  0xf1   : > { %975 = vmatprep.mubr.bf16.mxu0 %v2425_v11 }
  0xf8   : > { %976 = vmatmul.mubr.bf16.gmra.mrb[60].mxu0 %v2427_v12  ;;  %v361_v12 = vld [vmem:[%s4784_s2 + $0x40] sm:$0xff] }
  0xf9   : > { %985 = vmatprep.mubr.bf16.mxu0 %v2428_v13 }
 0x100   : > { %986 = vmatmul.mubr.bf16.gmra.mrb[64].mxu0 %v2430_v14 }
 0x101   : > { %995 = vmatprep.mubr.bf16.mxu0 %v2431_v15  ;;  %v368_v15 = vld [vmem:[%s4784_s2 + $0x78] sm:$0xff] }
 0x108   : > { %996 = vmatmul.mubr.bf16.gmra.mrb[68].mxu0 %v2433_v16 }
 0x153   : > { %v827_v22 = vpop.f32.mrb[0].mxu0 }
 0x154   : > { %v829_v24 = vpop.f32.mrb[1].mxu0  ;;  %v828_v26 = vadd.f32 %v827_v22, %v396_v21 }
 0x155   : > { %v831_v25 = vpop.f32.mrb[2].mxu0  ;;  %v830_v29 = vadd.f32 %v829_v24, %v396_v21  ;;  %v370_v21 = vld [vmem:[%s4784_s2 + $0x88] sm:$0xff]  ;;  %v365_v24 = vld [vmem:[%s4784_s2 + $0x60] sm:$0xff] }
 0x156   : > { %v832_v27 = vadd.f32 %v831_v25, %v401_v23  ;;  %v833_v28 = vpop.f32.mrb[3].mxu0 }
 0x157   : > { %v834_v30 = vadd.f32 %v833_v28, %v401_v23 }
 0x158   : > { %v2285_v31 = vpack.c.bf16 %v832_v27, %v828_v26  ;;  %v372_v27 = vld [vmem:[%s4784_s2 + $0x98] sm:$0xff] }
 0x159   : > { %v2283_v32 = vpack.c.bf16 %v834_v30, %v830_v29  ;;  %v367_v30 = vld [vmem:[%s4784_s2 + $0x70] sm:$0xff] }
 0x15b   : > { %v837_v34 = vpop.f32.mrb[4].mxu0  ;;  %2284 = vmatprep.subr.bf16.mxu1 %v2283_v32 }
 0x15c   : > { %v839_v36 = vpop.f32.mrb[5].mxu0  ;;  %2286 = vmatpush1.bf16.msra.mxu1 %v2285_v31  ;;  %v838_v38 = vadd.f32 %v837_v34, %v406_v33 }
 0x15d   : > { %v841_v37 = vpop.f32.mrb[6].mxu0  ;;  %v840_v41 = vadd.f32 %v839_v36, %v406_v33  ;;  %v374_v33 = vld [vmem:[%s4784_s2 + $0xa8] sm:$0xff]  ;;  %v369_v36 = vld [vmem:[%s4784_s2 + $0x80] sm:$0xff] }
 0x15e   : > { %v842_v39 = vadd.f32 %v841_v37, %v411_v35  ;;  %v843_v40 = vpop.f32.mrb[7].mxu0 }
 0x15f   : > { %v844_v42 = vadd.f32 %v843_v40, %v411_v35 }
 0x160   : > { %v2289_v43 = vpack.c.bf16 %v842_v39, %v838_v38  ;;  %v376_v39 = vld [vmem:[%s4784_s2 + $0xb8] sm:$0xff] }
 0x161   : > { %v2287_v44 = vpack.c.bf16 %v844_v42, %v840_v41  ;;  %v371_v42 = vld [vmem:[%s4784_s2 + $0x90] sm:$0xff] }
 0x163   : > { %v847_v45 = vpop.f32.mrb[8].mxu0  ;;  %2288 = vmatprep.subr.bf16.mxu1 %v2287_v44 }
 0x164   : > { %v848_v46 = vadd.f32 %v847_v45, %v416_v17  ;;  %v849_v47 = vpop.f32.mrb[9].mxu0  ;;  %2290 = vmatpush1.bf16.msra.mxu1 %v2289_v43  ;;  %v378_v45 = vld [vmem:[%s4784_s2 + $0xc8] sm:$0xff] }
 0x165   : > { %v850_v48 = vadd.f32 %v849_v47, %v416_v17  ;;  %v851_v49 = vpop.f32.mrb[10].mxu0 }
 0x166   : > { %v853_v50 = vpop.f32.mrb[11].mxu0  ;;  %1026 = vxpose.xlu0.b32.start [1/4] (short) %v848_v46, 128  ;;  %v852_v52 = vadd.f32 %v851_v49, %v421_v19 }
 0x167   : > { %1058 = vxpose.xlu1.b32.start [1/4] (short) %v850_v48, 128  ;;  %v854_v53 = vadd.f32 %v853_v50, %v421_v19  ;;  %v373_v48 = vld [vmem:[%s4784_s2 + $0xa0] sm:$0xff] }
 0x16a   : > { %1027 = vxpose.xlu0.b32.cont [2/4] (short) %v852_v52, 128  ;;  %v380_v52 = vld [vmem:[%s4784_s2 + $0xd8] sm:$0xff] }
 0x16b   : > { %v857_v54 = vpop.f32.mrb[12].mxu0  ;;  %1059 = vxpose.xlu1.b32.cont [2/4] (short) %v854_v53, 128 }
 0x16c   : > { %v858_v55 = vadd.f32 %v857_v54, %v426_v18  ;;  %v859_v56 = vpop.f32.mrb[13].mxu0 }
 0x16d   : > { %v860_v57 = vadd.f32 %v859_v56, %v426_v18  ;;  %v861_v58 = vpop.f32.mrb[14].mxu0  ;;  %v363_v18 = vld [vmem:[%s4784_s2 + $0x50] sm:$0xff] }
 0x16e   : > { %v863_v59 = vpop.f32.mrb[15].mxu0  ;;  %1028 = vxpose.xlu0.b32.cont [3/4] (short) %v858_v55, 128  ;;  %v862_v60 = vadd.f32 %v861_v58, %v431_v20  ;;  %v375_v55 = vld [vmem:[%s4784_s2 + $0xb0] sm:$0xff] }
 0x16f   : > { %1060 = vxpose.xlu1.b32.cont [3/4] (short) %v860_v57, 128  ;;  %v864_v61 = vadd.f32 %v863_v59, %v431_v20  ;;  %v382_v59 = vld [vmem:[%s4784_s2 + $0xe8] sm:$0xff] }
 0x172   : > { %1029 = vxpose.xlu0.b32.end [4/4] (short) %v862_v60, 128 }
 0x173   : > { %1061 = vxpose.xlu1.b32.end [4/4] (short) %v864_v61, 128  ;;  %v3092_v62 = vpop.f32.mrb[16].mxu0 }
 0x174   : > { %v3094_v63 = vpop.f32.mrb[17].mxu0 }
 0x175   : > { %v3096_v0 = vpop.f32.mrb[18].mxu0 }
 0x176   : > { %v3101_v2 = vpop.f32.mrb[19].mxu0 }
 0x17b   : > { %v3103_v3 = vpop.f32.mrb[20].mxu0 }
 0x17c   : > { %v3108_v5 = vpop.f32.mrb[21].mxu0 }
 0x17d   : > { %v3110_v6 = vpop.f32.mrb[22].mxu0 }
 0x17e   : > { %v3112_v7 = vpop.f32.mrb[23].mxu0 }
 0x183   : > { %v3114_v8 = vpop.f32.mrb[24].mxu0 }
 0x184   : > { %v3119_v10 = vpop.f32.mrb[25].mxu0 }
 0x185   : > { %v3121_v11 = vpop.f32.mrb[26].mxu0 }
 0x186   : > { %v3126_v13 = vpop.f32.mrb[27].mxu0 }
 0x18b   : > { %v3128_v14 = vpop.f32.mrb[28].mxu0 }
 0x18c   : > { %v3133_v16 = vpop.f32.mrb[29].mxu0 }
 0x18d   : > { %v3135_v17 = vpop.f32.mrb[30].mxu0 }
 0x18e   : > { %v3140_v19 = vpop.f32.mrb[31].mxu0 }
 0x193   : > { %v3142_v20 = vpop.f32.mrb[32].mxu0 }
 0x194   : > { %v3147_v22 = vpop.f32.mrb[33].mxu0 }
 0x195   : > { %v3149_v23 = vpop.f32.mrb[34].mxu0 }
 0x196   : > { %v3154_v25 = vpop.f32.mrb[35].mxu0 }
 0x19b   : > { %v3156_v26 = vpop.f32.mrb[36].mxu0 }
 0x19c   : > { %v3161_v28 = vpop.f32.mrb[37].mxu0 }
 0x19d   : > { %v3163_v29 = vpop.f32.mrb[38].mxu0 }
 0x19e   : > { %v3168_v31 = vpop.f32.mrb[39].mxu0 }
 0x1a3   : > { %v3170_v32 = vpop.f32.mrb[40].mxu0 }
 0x1a4   : > { %v3175_v34 = vpop.f32.mrb[41].mxu0 }
 0x1a5   : > { %v3177_v35 = vpop.f32.mrb[42].mxu0 }
 0x1a6   : > { %v3182_v37 = vpop.f32.mrb[43].mxu0 }
 0x1ab   : > { %v3184_v38 = vpop.f32.mrb[44].mxu0 }
 0x1ac   : > { %v3189_v40 = vpop.f32.mrb[45].mxu0 }
 0x1ad   : > { %v3191_v41 = vpop.f32.mrb[46].mxu0 }
 0x1ae   : > { %v3196_v43 = vpop.f32.mrb[47].mxu0 }
 0x1b3   : > { %v3198_v44 = vpop.f32.mrb[48].mxu0 }
 0x1b4   : > { %v3203_v46 = vpop.f32.mrb[49].mxu0 }
 0x1b5   : > { %4884 = vst [vmem:[#allocation9_spill] sm:$0xff] %v3203_v46  ;;  %v3205_v47 = vpop.f32.mrb[50].mxu0 }
 0x1b6   : > { %v3210_v49 = vpop.f32.mrb[51].mxu0 }
 0x1bb   : > { %v3212_v50 = vpop.f32.mrb[52].mxu0 }
 0x1bc   : > { %v3217_v53 = vpop.f32.mrb[53].mxu0 }
 0x1bd   : > { %4885 = vst [vmem:[#allocation10_spill] sm:$0xff] %v3217_v53  ;;  %v3219_v54 = vpop.f32.mrb[54].mxu0 }
 0x1be   : > { %v3224_v56 = vpop.f32.mrb[55].mxu0 }
 0x1c1   : > { %440 = vperm.xlu1 %2376, %v362_v1  }
 0x1c3   : > { %v3226_v57 = vpop.f32.mrb[56].mxu0 }
 0x1c4   : > { %4886 = vst [vmem:[#allocation11_spill] sm:$0xff] %v3226_v57  ;;  %v3231_v60 = vpop.f32.mrb[57].mxu0 }
 0x1c5   : > { %450 = vperm.xlu1 %2376, %v364_v4   ;;  %4887 = vst [vmem:[#allocation12_spill] sm:$0xff] %v3231_v60  ;;  %v3236_v1 = vpop.f32.mrb[58].mxu0  ;;  %v377_v4 = vld [vmem:[%s4784_s2 + $0xc0] sm:$0xff] }
 0x1c9   : > { %460 = vperm.xlu1 %2376, %v366_v9   ;;  %v3242_v9 = vpop.f32.mrb[59].mxu0 }
 0x1cb   : > { %435 = vperm.xlu0 %2375, %v361_v12   ;;  %v3244_v12 = vpop.f32.mrb[60].mxu0 }
 0x1cc   : > { %4888 = vst [vmem:[#allocation13_spill] sm:$0xff] %v3244_v12 }
 0x1cd   : > { %470 = vperm.xlu1 %2376, %v368_v15  }
 0x1cf   : > { %445 = vperm.xlu0 %2375, %v363_v18   ;;  %v384_v18 = vld [vmem:[%s4784_s2 + $0xf8] sm:$0xff] }
 0x1d1   : > { %480 = vperm.xlu1 %2376, %v370_v21   ;;  %v3249_v21 = vpop.f32.mrb[61].mxu0 }
 0x1d2   : > { %4889 = vst [vmem:[#allocation14_spill] sm:$0xff] %v3249_v21 }
 0x1d3   : > { %455 = vperm.xlu0 %2375, %v365_v24  }
 0x1d5   : > { %490 = vperm.xlu1 %2376, %v372_v27   ;;  %v3254_v27 = vpop.f32.mrb[62].mxu0 }
 0x1d7   : > { %465 = vperm.xlu0 %2375, %v367_v30   ;;  %v379_v30 = vld [vmem:[%s4784_s2 + $0xd0] sm:$0xff] }
 0x1d9   : > { %500 = vperm.xlu1 %2376, %v374_v33   ;;  %v3260_v33 = vpop.f32.mrb[63].mxu0 }
 0x1db   : > { %475 = vperm.xlu0 %2375, %v369_v36   ;;  %v3262_v36 = vpop.f32.mrb[64].mxu0 }
 0x1dc   : > { %4890 = vst [vmem:[#allocation15_spill] sm:$0xff] %v3262_v36 }
 0x1dd   : > { %510 = vperm.xlu1 %2376, %v376_v39  }
 0x1df   : > { %485 = vperm.xlu0 %2375, %v371_v42   ;;  %v386_v42 = vld [vmem:[%s4784_s2 + $0x108] sm:$0xff] }
 0x1e1   : > { %520 = vperm.xlu1 %2376, %v378_v45   ;;  %v3267_v45 = vpop.f32.mrb[65].mxu0 }
 0x1e2   : > { %4891 = vst [vmem:[#allocation16_spill] sm:$0xff] %v3267_v45  ;;  %v3298_v45 = vpop.f32.mrb[0].mxu1 }
 0x1e3   : > { %495 = vperm.xlu0 %2375, %v373_v48   ;;  %4897 = vst [vmem:[#allocation22_spill] sm:$0xff] %v3298_v45 }
 0x1e5   : > { %530 = vperm.xlu1 %2376, %v380_v52   ;;  %v3272_v52 = vpop.f32.mrb[66].mxu0 }
 0x1e6   : > { %v1042_v58 = vpop.trf.xlu0 }
 0x1e7   : > { %505 = vperm.xlu0 %2375, %v375_v55   ;;  %2244 = vmatmul.mubr.msk.f32.vlgmr.msra.gmra.mrb[8].mxu1 %vm1090_vm0, %v1042_v58  ;;  %v3234_v61 = vpop.trf.xlu1  ;;  %v381_v55 = vld [vmem:[%s4784_s2 + $0xe0] sm:$0xff]  ;;  %v3278_v58 = vpop.f32.mrb[67].mxu0 }
 0x1e8   : > { %1257 = vmatprep.mubr.f32.mxu1 %v4788_v51  ;;  %4892 = vst [vmem:[#allocation17_spill] sm:$0xff] %v3278_v58 }
 0x1e9   : > { %540 = vperm.xlu1 %2376, %v382_v59   ;;  %v3280_v59 = vpop.f32.mrb[68].mxu0 }
 0x1ea   : > { %v1043_v15 = vpop.trf.xlu0  ;;  %4893 = vst [vmem:[#allocation18_spill] sm:$0xff] %v3280_v59 }
 0x1eb   : > { %515 = vperm.xlu0 %2375, %v377_v4   ;;  %2245 = vmatmul.mubr.msk.f32.gmra.mrb[10].mxu1 %vm1090_vm0, %v1043_v15  ;;  %v3252_v24 = vpop.trf.xlu1  ;;  %v388_v15 = vld [vmem:[%s4784_s2 + $0x118] sm:$0xff] }
 0x1ec   : > { %1263 = vmatprep.mubr.f32.mxu1 %v4788_v51 }
 0x1ed   : > { %550 = vperm.xlu1 %2376, %v384_v18   ;;  %v3285_v18 = vpop.f32.mrb[69].mxu0 }
 0x1ee   : > { %v1044_v39 = vpop.trf.xlu0  ;;  %4894 = vst [vmem:[#allocation19_spill] sm:$0xff] %v3285_v18  ;;  %v4900_v18 = vmov 0.0  }
 0x1ef   : > { %525 = vperm.xlu0 %2375, %v379_v30   ;;  %2246 = vmatmul.mubr.msk.f32.gmra.mrb[12].mxu1 %vm1090_vm0, %v1044_v39  ;;  %v3270_v48 = vpop.trf.xlu1  ;;  %v3290_v39 = vpop.f32.mrb[70].mxu0 }
 0x1f0   : > { %1269 = vmatprep.mubr.f32.mxu1 %v4788_v51  ;;  %4895 = vst [vmem:[#allocation20_spill] sm:$0xff] %v3290_v39  ;;  %v3296_v58 = vpop.f32.mrb[71].mxu0 }
 0x1f1   : > { %560 = vperm.xlu1 %2376, %v386_v42   ;;  %v383_v42 = vld [vmem:[%s4784_s2 + $0xf0] sm:$0xff]  ;;  %4896 = vst [vmem:[#allocation21_spill] sm:$0xff] %v3296_v58 }
 0x1f2   : > { %v1045_v4 = vpop.trf.xlu0 }
 0x1f3   : > { %535 = vperm.xlu0 %2375, %v381_v55   ;;  %2247 = vmatmul.mubr.msk.f32.gmra.mrb[14].mxu1 %vm1090_vm0, %v1045_v4  ;;  %v3288_v30 = vpop.trf.xlu1  ;;  %v390_v55 = vld [vmem:[%s4784_s2 + $0x128] sm:$0xff]  ;;  %v3303_v4 = vpop.f32.mrb[1].mxu1 }
 0x1f4   : > { %1275 = vmatprep.mubr.f32.mxu1 %v4788_v51  ;;  %4898 = vst [vmem:[#allocation23_spill] sm:$0xff] %v3303_v4  ;;  %v3306_v51 = vpop.f32.mrb[2].mxu1 }
 0x1f5   : > { %570 = vperm.xlu1 %2376, %v388_v15   ;;  %4899 = vst [vmem:[#allocation24_spill] sm:$0xff] %v3306_v51  ;;  %v385_v15 = vld [vmem:[%s4784_s2 + $0x100] sm:$0xff]  ;;  %v3314_v60 = vpop.f32.mrb[3].mxu1 }
 0x1f6   : > { %v1046_v21 = vpop.trf.xlu0  ;;  %4901 = vst [vmem:[#allocation25_spill] sm:$0xff] %v3314_v60  ;;  %v3316_v53 = vpop.f32.mrb[4].mxu1 }
 0x1f7   : > { %545 = vperm.xlu0 %2375, %v383_v42   ;;  %2248 = vmatmul.mubr.msk.f32.gmra.mrb[16].mxu1 %vm1090_vm0, %v1046_v21  ;;  %v3312_v58 = vpop.trf.xlu1  ;;  %4902 = vst [vmem:[#allocation26_spill] sm:$0xff] %v3316_v53  ;;  %v392_v21 = vld [vmem:[%s4784_s2 + $0x138] sm:$0xff]  ;;  %v3321_v42 = vpop.f32.mrb[5].mxu1 }
 0x1f8   : > { %1281 = vmatprep.mubr.f32.mxu1 %v4900_v18  ;;  %4903 = vst [vmem:[#allocation27_spill] sm:$0xff] %v3321_v42  ;;  %v3324_v4 = vpop.f32.mrb[6].mxu1 }
 0x1f9   : > { %580 = vperm.xlu1 %2376, %v390_v55   ;;  %4904 = vst [vmem:[#allocation28_spill] sm:$0xff] %v3324_v4  ;;  %v387_v55 = vld [vmem:[%s4784_s2 + $0x110] sm:$0xff]  ;;  %v3330_v60 = vpop.f32.mrb[7].mxu1 }
 0x1fa   : > { %v1047_v46 = vpop.trf.xlu0  ;;  %4905 = vst [vmem:[#allocation29_spill] sm:$0xff] %v3330_v60 }
 0x1fb   : > { %555 = vperm.xlu0 %2375, %v385_v15   ;;  %2249 = vmatmul.mubr.msk.f32.gmra.mrb[18].mxu1 %vm1090_vm0, %v1047_v46  ;;  %v1079_v45 = vpop.trf.xlu1  ;;  %v389_v46 = vld [vmem:[%s4784_s2 + $0x120] sm:$0xff] }
 0x1fc   : > { %1287 = vmatprep.mubr.f32.mxu1 %v4900_v18 }
 0x1fd   : > { %590 = vperm.xlu1 %2376, %v392_v21   ;;  %v391_v21 = vld [vmem:[%s4784_s2 + $0x130] sm:$0xff] }
 0x1fe   : > { %v1048_v53 = vpop.trf.xlu0 }
 0x1ff   : > { %565 = vperm.xlu0 %2375, %v387_v55   ;;  %2250 = vmatmul.mubr.msk.f32.gmra.mrb[20].mxu1 %vm1090_vm0, %v1048_v53  ;;  %v1080_v60 = vpop.trf.xlu1 }
 0x200   : > { %1293 = vmatprep.mubr.f32.mxu1 %v4900_v18 }
 0x202   : > { %v1049_v15 = vpop.trf.xlu0 }
 0x203   : > { %575 = vperm.xlu0 %2375, %v389_v46   ;;  %2251 = vmatmul.mubr.msk.f32.gmra.mrb[22].mxu1 %vm1090_vm0, %v1049_v15  ;;  %v1081_v42 = vpop.trf.xlu1 }
 0x204   : > { %1299 = vmatprep.mubr.f32.mxu1 %v4900_v18 }
 0x206   : > { %v1050_v55 = vpop.trf.xlu0 }
 0x207   : > { %585 = vperm.xlu0 %2375, %v391_v21   ;;  %2252 = vmatmul.mubr.msk.f32.gmra.mrb[24].mxu1 %vm1090_vm0, %v1050_v55  ;;  %v1082_v15 = vpop.trf.xlu1 }
 0x208   : > { %1305 = vmatprep.mubr.f32.mxu1 %v4900_v18 }
 0x20a   : > { %v1051_v53 = vpop.trf.xlu0 }
 0x20b   : > { %2253 = vmatmul.mubr.msk.f32.gmra.mrb[26].mxu1 %vm1090_vm0, %v1051_v53  ;;  %v1083_v55 = vpop.trf.xlu1 }
 0x20c   : > { %1311 = vmatprep.mubr.f32.mxu1 %v4900_v18 }
 0x20e   : > { %v1052_v46 = vpop.trf.xlu0 }
 0x20f   : > { %2254 = vmatmul.mubr.msk.f32.gmra.mrb[28].mxu1 %vm1090_vm0, %v1052_v46  ;;  %v1084_v46 = vpop.trf.xlu1 }
 0x210   : > { %1317 = vmatprep.mubr.f32.mxu1 %v4900_v18 }
 0x212   : > { %v1053_v59 = vpop.trf.xlu0 }
 0x213   : > { %2255 = vmatmul.mubr.msk.f32.gmra.mrb[30].mxu1 %vm1090_vm0, %v1053_v59  ;;  %v1085_v36 = vpop.trf.xlu1 }
 0x214   : > { %1323 = vmatprep.mubr.f32.mxu1 %v4900_v18 }
 0x216   : > { %v1054_v21 = vpop.trf.xlu0 }
 0x217   : > { %2256 = vmatmul.mubr.msk.f32.gmra.mrb[32].mxu1 %vm1090_vm0, %v1054_v21  ;;  %v1086_v21 = vpop.trf.xlu1 }
 0x218   : > { %1329 = vmatprep.mubr.f32.mxu1 %v4900_v18 }
 0x21a   : > { %v1055_v53 = vpop.trf.xlu0 }
 0x21b   : > { %2257 = vmatmul.mubr.msk.f32.gmra.mrb[34].mxu1 %vm1090_vm0, %v1055_v53 }
 0x21c   : > { %1335 = vmatprep.mubr.f32.mxu1 %v4900_v18 }
 0x21e   : > { %v1056_v4 = vpop.trf.xlu0 }
 0x21f   : > { %2258 = vmatmul.mubr.msk.f32.gmra.mrb[36].mxu1 %vm1090_vm0, %v1056_v4  ;;  %v1087_v4 = vpop.trf.xlu1 }
 0x220   : > { %1341 = vmatprep.mubr.f32.mxu1 %v4900_v18 }
 0x222   : > { %v1057_v59 = vpop.trf.xlu0 }
 0x223   : > { %2259 = vmatmul.mubr.msk.f32.gmra.mrb[38].mxu1 %vm1090_vm0, %v1057_v59 }
 0x224   : > { %1347 = vmatprep.mubr.f32.mxu1 %v4900_v18 }
 0x227   : > { %2260 = vmatmul.mubr.msk.f32.gmra.mrb[40].mxu1 %vm1090_vm0, %v3234_v61  ;;  %v1088_v61 = vpop.trf.xlu1 }
 0x228   : > { %1353 = vmatprep.mubr.f32.mxu1 %v4900_v18 }
 0x22b   : > { %2261 = vmatmul.mubr.msk.f32.gmra.mrb[42].mxu1 %vm1090_vm0, %v3252_v24  ;;  %v1089_v24 = vpop.trf.xlu1 }
 0x22c   : > { %1359 = vmatprep.mubr.f32.mxu1 %v4900_v18 }
 0x22f   : > { %2262 = vmatmul.mubr.msk.f32.gmra.mrb[44].mxu1 %vm1090_vm0, %v3270_v48 }
 0x230   : > { %1365 = vmatprep.mubr.f32.mxu1 %v4900_v18 }
 0x233   : > { %2263 = vmatmul.mubr.msk.f32.gmra.mrb[46].mxu1 %vm1090_vm0, %v3288_v30 }
 0x234   : > { %1371 = vmatprep.mubr.f32.mxu1 %v4900_v18 }
 0x237   : > { %2264 = vmatmul.mubr.msk.f32.gmra.mrb[48].mxu1 %vm1090_vm0, %v3312_v58 }
 0x238   : > { %1377 = vmatprep.mubr.f32.mxu1 %v4900_v18 }
 0x23b   : > { %2265 = vmatmul.mubr.msk.f32.gmra.mrb[50].mxu1 %vm1090_vm0, %v1079_v45 }
 0x23c   : > { %1383 = vmatprep.mubr.f32.mxu1 %v4900_v18 }
 0x23f   : > { %2266 = vmatmul.mubr.msk.f32.gmra.mrb[52].mxu1 %vm1090_vm0, %v1080_v60 }
 0x240   : > { %v441_v48 = vpop.permute.xlu1 %440  ;;  %1389 = vmatprep.mubr.f32.mxu1 %v4900_v18 }
 0x241   : > { %v3378_v30 = vadd.f32 %v3096_v0, %v441_v48  ;;  %v3381_v53 = vadd.f32 %v3101_v2, %v441_v48 }
 0x243   : > { %4906 = vst [vmem:[#allocation30_spill] sm:$0xff] %v3378_v30  ;;  %4907 = vst [vmem:[#allocation31_spill] sm:$0xff] %v3381_v53  ;;  %2267 = vmatmul.mubr.msk.f32.gmra.mrb[54].mxu1 %vm1090_vm0, %v1081_v42 }
 0x244   : > { %v451_v58 = vpop.permute.xlu1 %450  ;;  %1395 = vmatprep.mubr.f32.mxu1 %v4900_v18 }
 0x245   : > { %v3386_v45 = vadd.f32 %v3110_v6, %v451_v58  ;;  %v3389_v59 = vadd.f32 %v3112_v7, %v451_v58 }
 0x247   : > { %4908 = vst [vmem:[#allocation32_spill] sm:$0xff] %v3386_v45  ;;  %4909 = vst [vmem:[#allocation33_spill] sm:$0xff] %v3389_v59  ;;  %2268 = vmatmul.mubr.msk.f32.gmra.mrb[56].mxu1 %vm1090_vm0, %v1082_v15 }
 0x248   : > { %v461_v60 = vpop.permute.xlu1 %460  ;;  %1401 = vmatprep.mubr.f32.mxu1 %v4900_v18 }
 0x249   : > { %v3394_v0 = vadd.f32 %v3121_v11, %v461_v60  ;;  %v3397_v2 = vadd.f32 %v3126_v13, %v461_v60 }
 0x24a   : > { %v3399_v42 = vpop.permute.xlu0 %435 }
 0x24b   : > { %4910 = vst [vmem:[#allocation34_spill] sm:$0xff] %v3394_v0  ;;  %4911 = vst [vmem:[#allocation35_spill] sm:$0xff] %v3397_v2  ;;  %v3403_v6 = vadd.f32 %v3094_v63, %v3399_v42  ;;  %2269 = vmatmul.mubr.msk.f32.gmra.mrb[58].mxu1 %vm1090_vm0, %v1083_v55 }
 0x24c   : > { %v471_v7 = vpop.permute.xlu1 %470  ;;  %1407 = vmatprep.mubr.f32.mxu1 %v4900_v18 }
 0x24d   : > { %4912 = vst [vmem:[#allocation36_spill] sm:$0xff] %v3403_v6  ;;  %v3408_v15 = vadd.f32 %v3135_v17, %v471_v7  ;;  %v3411_v11 = vadd.f32 %v3140_v19, %v471_v7 }
 0x24e   : > { %v3413_v48 = vpop.permute.xlu0 %445 }
 0x24f   : > { %4913 = vst [vmem:[#allocation37_spill] sm:$0xff] %v3408_v15  ;;  %4914 = vst [vmem:[#allocation38_spill] sm:$0xff] %v3411_v11  ;;  %v3417_v13 = vadd.f32 %v3108_v5, %v3413_v48  ;;  %2270 = vmatmul.mubr.msk.f32.gmra.mrb[60].mxu1 %vm1090_vm0, %v1084_v46 }
 0x250   : > { %v3420_v63 = vpop.permute.xlu1 %480  ;;  %1413 = vmatprep.mubr.f32.mxu1 %v4900_v18 }
 0x251   : > { %4915 = vst [vmem:[#allocation39_spill] sm:$0xff] %v3417_v13  ;;  %v3425_v55 = vadd.f32 %v3154_v25, %v3420_v63 }
 0x252   : > { %v3427_v17 = vpop.permute.xlu0 %455 }
 0x253   : > { %4916 = vst [vmem:[#allocation40_spill] sm:$0xff] %v3425_v55  ;;  %v3431_v19 = vadd.f32 %v3119_v10, %v3427_v17  ;;  %2271 = vmatmul.mubr.msk.f32.gmra.mrb[62].mxu1 %vm1090_vm0, %v1085_v36 }
 0x254   : > { %v3434_v5 = vpop.permute.xlu1 %490  ;;  %1419 = vmatprep.mubr.f32.mxu1 %v4900_v18 }
 0x255   : > { %4917 = vst [vmem:[#allocation41_spill] sm:$0xff] %v3431_v19  ;;  %v3439_v46 = vadd.f32 %v3168_v31, %v3434_v5 }
 0x256   : > { %v3441_v58 = vpop.permute.xlu0 %465 }
 0x257   : > { %4918 = vst [vmem:[#allocation42_spill] sm:$0xff] %v3439_v46  ;;  %v3445_v25 = vadd.f32 %v3133_v16, %v3441_v58  ;;  %2272 = vmatmul.mubr.msk.f32.gmra.mrb[64].mxu1 %vm1090_vm0, %v1086_v21 }
 0x258   : > { %v3448_v10 = vpop.permute.xlu1 %500  ;;  %1425 = vmatprep.mubr.f32.mxu1 %v4900_v18 }
 0x259   : > { %4919 = vst [vmem:[#allocation43_spill] sm:$0xff] %v3445_v25  ;;  %v3453_v36 = vadd.f32 %v3182_v37, %v3448_v10 }
 0x25a   : > { %v3455_v60 = vpop.permute.xlu0 %475 }
 0x25b   : > { %4920 = vst [vmem:[#allocation44_spill] sm:$0xff] %v3453_v36  ;;  %v3459_v31 = vadd.f32 %v3147_v22, %v3455_v60  ;;  %2273 = vmatmul.mubr.msk.f32.gmra.mrb[66].mxu1 %vm1090_vm0, %v1087_v4 }
 0x25c   : > { %v3462_v16 = vpop.permute.xlu1 %510  ;;  %1431 = vmatprep.mubr.f32.mxu1 %v4900_v18 }
 0x25d   : > { %4921 = vst [vmem:[#allocation45_spill] sm:$0xff] %v3459_v31  ;;  %v3467_v21 = vadd.f32 %v3196_v43, %v3462_v16 }
 0x25e   : > { %v3469_v7 = vpop.permute.xlu0 %485 }
 0x25f   : > { %4922 = vst [vmem:[#allocation46_spill] sm:$0xff] %v3467_v21  ;;  %v3473_v37 = vadd.f32 %v3161_v28, %v3469_v7  ;;  %2274 = vmatmul.mubr.msk.f32.gmra.mrb[68].mxu1 %vm1090_vm0, %v1088_v61 }
 0x260   : > { %v3476_v22 = vpop.permute.xlu1 %520  ;;  %1437 = vmatprep.mubr.f32.mxu1 %v4900_v18 }
 0x261   : > { %4923 = vst [vmem:[#allocation47_spill] sm:$0xff] %v3473_v37  ;;  %v3481_v4 = vadd.f32 %v3210_v49, %v3476_v22 }
 0x263   : > { %4924 = vst [vmem:[#allocation48_spill] sm:$0xff] %v3481_v4  ;;  %2275 = vmatmul.mubr.msk.f32.gmra.mrb[70].mxu1 %vm1090_vm0, %v1089_v24 }
 0x264   : > { %v3484_v43 = vpop.permute.xlu1 %530 }
 0x265   : > { %v3488_v21 = vadd.f32 %v3224_v56, %v3484_v43 }
 0x267   : > { %4925 = vst [vmem:[#allocation49_spill] sm:$0xff] %v3488_v21 }
 0x268   : > { %v3490_v28 = vpop.permute.xlu1 %540 }
 0x269   : > { %v3494_v61 = vadd.f32 %v3242_v9, %v3490_v28 }
 0x26b   : > { %4926 = vst [vmem:[#allocation50_spill] sm:$0xff] %v3494_v61 }
 0x26c   : > { %v3496_v36 = vpop.permute.xlu1 %550 }
 0x26d   : > { %v3500_v49 = vadd.f32 %v3260_v33, %v3496_v36 }
 0x26f   : > { %4927 = vst [vmem:[#allocation51_spill] sm:$0xff] %v3500_v49 }
 0x2ba   : > { %v3502_v18 = vpop.f32.mrb[8].mxu1 }
 0x2bb   : > { %v3504_v24 = vpop.f32.mrb[9].mxu1 }
 0x2bc   : > { %4928 = vst [vmem:[#allocation52_spill] sm:$0xff] %v3504_v24 }
 0x2be   : > { %v3506_v4 = vpop.f32.mrb[10].mxu1 }
 0x2bf   : > { %v3508_v56 = vpop.f32.mrb[11].mxu1 }
 0x2c0   : > { %4929 = vst [vmem:[#allocation53_spill] sm:$0xff] %v3508_v56 }
 0x2c2   : > { %v3510_v21 = vpop.f32.mrb[12].mxu1 }
 0x2c3   : > { %v1444_v9 = vmax.f32 %v3502_v18, %v3510_v21  ;;  %v3514_v61 = vpop.f32.mrb[13].mxu1 }
 0x2c4   : > { %4930 = vst [vmem:[#allocation54_spill] sm:$0xff] %v3514_v61  ;;  %v1481_v46 = vmax.f32 %v3504_v24, %v3514_v61 }
 0x2c6   : > { %v3518_v33 = vpop.f32.mrb[14].mxu1 }
 0x2c7   : > { %v1445_v49 = vmax.f32 %v3506_v4, %v3518_v33  ;;  %v3522_v37 = vpop.f32.mrb[15].mxu1 }
 0x2c8   : > { %4931 = vst [vmem:[#allocation55_spill] sm:$0xff] %v3522_v37  ;;  %v1482_v55 = vmax.f32 %v3508_v56, %v3522_v37 }
 0x2ca   : > { %v3526_v31 = vpop.f32.mrb[16].mxu1 }
 0x2cb   : > { %v1446_v11 = vmax.f32 %v1444_v9, %v3526_v31  ;;  %v3529_v25 = vpop.f32.mrb[17].mxu1 }
 0x2cc   : > { %4932 = vst [vmem:[#allocation56_spill] sm:$0xff] %v3529_v25  ;;  %v1483_v2 = vmax.f32 %v1481_v46, %v3529_v25 }
 0x2ce   : > { %v3532_v19 = vpop.f32.mrb[18].mxu1 }
 0x2cf   : > { %v1447_v59 = vmax.f32 %v1445_v49, %v3532_v19  ;;  %v3535_v13 = vpop.f32.mrb[19].mxu1 }
 0x2d0   : > { %4933 = vst [vmem:[#allocation57_spill] sm:$0xff] %v3535_v13  ;;  %v1484_v53 = vmax.f32 %v1482_v55, %v3535_v13 }
 0x2d2   : > { %v3538_v6 = vpop.f32.mrb[20].mxu1 }
 0x2d3   : > { %v1448_v51 = vmax.f32 %v1446_v11, %v3538_v6  ;;  %v3541_v12 = vpop.f32.mrb[21].mxu1 }
 0x2d4   : > { %4934 = vst [vmem:[#allocation58_spill] sm:$0xff] %v3541_v12  ;;  %v1485_v9 = vmax.f32 %v1483_v2, %v3541_v12 }
 0x2d6   : > { %v3544_v15 = vpop.f32.mrb[22].mxu1 }
 0x2d7   : > { %v1449_v46 = vmax.f32 %v1447_v59, %v3544_v15  ;;  %v3547_v0 = vpop.f32.mrb[23].mxu1 }
 0x2d8   : > { %4935 = vst [vmem:[#allocation59_spill] sm:$0xff] %v3547_v0  ;;  %v1486_v49 = vmax.f32 %v1484_v53, %v3547_v0 }
 0x2da   : > { %v3550_v45 = vpop.f32.mrb[24].mxu1 }
 0x2db   : > { %v1450_v55 = vmax.f32 %v1448_v51, %v3550_v45  ;;  %v3553_v30 = vpop.f32.mrb[25].mxu1 }
 0x2dc   : > { %4936 = vst [vmem:[#allocation60_spill] sm:$0xff] %v3553_v30  ;;  %v1487_v11 = vmax.f32 %v1485_v9, %v3553_v30 }
 0x2de   : > { %v3556_v13 = vpop.f32.mrb[26].mxu1 }
 0x2df   : > { %4937 = vst [vmem:[#allocation61_spill] sm:$0xff] %v3556_v13  ;;  %v1451_v2 = vmax.f32 %v1449_v46, %v3556_v13  ;;  %v3559_v12 = vpop.f32.mrb[27].mxu1 }
 0x2e0   : > { %4938 = vst [vmem:[#allocation62_spill] sm:$0xff] %v3559_v12  ;;  %v1488_v59 = vmax.f32 %v1486_v49, %v3559_v12 }
 0x2e2   : > { %v3562_v25 = vpop.f32.mrb[28].mxu1 }
 0x2e3   : > { %4939 = vst [vmem:[#allocation63_spill] sm:$0xff] %v3562_v25  ;;  %v1452_v53 = vmax.f32 %v1450_v55, %v3562_v25  ;;  %v3565_v0 = vpop.f32.mrb[29].mxu1 }
 0x2e4   : > { %4940 = vst [vmem:[#allocation64_spill] sm:$0xff] %v3565_v0  ;;  %v1489_v51 = vmax.f32 %v1487_v11, %v3565_v0 }
 0x2e6   : > { %v3568_v37 = vpop.f32.mrb[30].mxu1 }
 0x2e7   : > { %4941 = vst [vmem:[#allocation65_spill] sm:$0xff] %v3568_v37  ;;  %v1453_v9 = vmax.f32 %v1451_v2, %v3568_v37  ;;  %v3571_v30 = vpop.f32.mrb[31].mxu1 }
 0x2e8   : > { %4942 = vst [vmem:[#allocation66_spill] sm:$0xff] %v3571_v30  ;;  %v1490_v46 = vmax.f32 %v1488_v59, %v3571_v30 }
 0x2ea   : > { %v3574_v61 = vpop.f32.mrb[32].mxu1 }
 0x2eb   : > { %4943 = vst [vmem:[#allocation67_spill] sm:$0xff] %v3574_v61  ;;  %v1454_v49 = vmax.f32 %v1452_v53, %v3574_v61  ;;  %v3577_v12 = vpop.f32.mrb[33].mxu1 }
 0x2ec   : > { %4944 = vst [vmem:[#allocation68_spill] sm:$0xff] %v3577_v12  ;;  %v1491_v55 = vmax.f32 %v1489_v51, %v3577_v12 }
 0x2ee   : > { %v3580_v56 = vpop.f32.mrb[34].mxu1 }
 0x2ef   : > { %4945 = vst [vmem:[#allocation69_spill] sm:$0xff] %v3580_v56  ;;  %v1455_v11 = vmax.f32 %v1453_v9, %v3580_v56  ;;  %v3583_v0 = vpop.f32.mrb[35].mxu1 }
 0x2f0   : > { %4946 = vst [vmem:[#allocation70_spill] sm:$0xff] %v3583_v0  ;;  %v1492_v2 = vmax.f32 %v1490_v46, %v3583_v0 }
 0x2f2   : > { %v3586_v39 = vpop.f32.mrb[36].mxu1 }
 0x2f3   : > { %4947 = vst [vmem:[#allocation71_spill] sm:$0xff] %v3586_v39  ;;  %v1456_v59 = vmax.f32 %v1454_v49, %v3586_v39  ;;  %v3589_v30 = vpop.f32.mrb[37].mxu1 }
 0x2f4   : > { %4948 = vst [vmem:[#allocation72_spill] sm:$0xff] %v3589_v30  ;;  %v1493_v53 = vmax.f32 %v1491_v55, %v3589_v30 }
 0x2f6   : > { %v3592_v57 = vpop.f32.mrb[38].mxu1 }
 0x2f7   : > { %4949 = vst [vmem:[#allocation73_spill] sm:$0xff] %v3592_v57  ;;  %v1457_v51 = vmax.f32 %v1455_v11, %v3592_v57  ;;  %v3595_v12 = vpop.f32.mrb[39].mxu1 }
 0x2f8   : > { %4950 = vst [vmem:[#allocation74_spill] sm:$0xff] %v3595_v12  ;;  %v1494_v9 = vmax.f32 %v1492_v2, %v3595_v12 }
 0x2fa   : > { %v3598_v24 = vpop.f32.mrb[40].mxu1 }
 0x2fb   : > { %4951 = vst [vmem:[#allocation75_spill] sm:$0xff] %v3598_v24  ;;  %v1458_v46 = vmax.f32 %v1456_v59, %v3598_v24  ;;  %v3601_v0 = vpop.f32.mrb[41].mxu1 }
 0x2fc   : > { %4952 = vst [vmem:[#allocation76_spill] sm:$0xff] %v3601_v0  ;;  %v1495_v49 = vmax.f32 %v1493_v53, %v3601_v0 }
 0x2fe   : > { %v3604_v39 = vpop.f32.mrb[42].mxu1 }
 0x2ff   : > { %4953 = vst [vmem:[#allocation77_spill] sm:$0xff] %v3604_v39  ;;  %v1459_v55 = vmax.f32 %v1457_v51, %v3604_v39  ;;  %v3607_v30 = vpop.f32.mrb[43].mxu1 }
 0x300   : > { %4954 = vst [vmem:[#allocation78_spill] sm:$0xff] %v3607_v30  ;;  %v1496_v11 = vmax.f32 %v1494_v9, %v3607_v30 }
 0x302   : > { %v3610_v57 = vpop.f32.mrb[44].mxu1 }
 0x303   : > { %4955 = vst [vmem:[#allocation79_spill] sm:$0xff] %v3610_v57  ;;  %v1460_v2 = vmax.f32 %v1458_v46, %v3610_v57  ;;  %v3613_v12 = vpop.f32.mrb[45].mxu1 }
 0x304   : > { %4956 = vst [vmem:[#allocation80_spill] sm:$0xff] %v3613_v12  ;;  %v1497_v59 = vmax.f32 %v1495_v49, %v3613_v12 }
 0x306   : > { %v3616_v24 = vpop.f32.mrb[46].mxu1 }
 0x307   : > { %4957 = vst [vmem:[#allocation81_spill] sm:$0xff] %v3616_v24  ;;  %v1461_v53 = vmax.f32 %v1459_v55, %v3616_v24  ;;  %v3619_v0 = vpop.f32.mrb[47].mxu1 }
 0x308   : > { %4958 = vst [vmem:[#allocation82_spill] sm:$0xff] %v3619_v0  ;;  %v1498_v51 = vmax.f32 %v1496_v11, %v3619_v0 }
 0x30a   : > { %v3622_v39 = vpop.f32.mrb[48].mxu1 }
 0x30b   : > { %4959 = vst [vmem:[#allocation83_spill] sm:$0xff] %v3622_v39  ;;  %v1462_v9 = vmax.f32 %v1460_v2, %v3622_v39  ;;  %v3625_v30 = vpop.f32.mrb[49].mxu1 }
 0x30c   : > { %4960 = vst [vmem:[#allocation84_spill] sm:$0xff] %v3625_v30  ;;  %v1499_v46 = vmax.f32 %v1497_v59, %v3625_v30 }
 0x30e   : > { %v3628_v57 = vpop.f32.mrb[50].mxu1 }
 0x30f   : > { %4961 = vst [vmem:[#allocation85_spill] sm:$0xff] %v3628_v57  ;;  %v1463_v49 = vmax.f32 %v1461_v53, %v3628_v57  ;;  %v3631_v12 = vpop.f32.mrb[51].mxu1 }
 0x310   : > { %4962 = vst [vmem:[#allocation86_spill] sm:$0xff] %v3631_v12  ;;  %v1500_v55 = vmax.f32 %v1498_v51, %v3631_v12 }
 0x312   : > { %v3634_v24 = vpop.f32.mrb[52].mxu1 }
 0x313   : > { %4963 = vst [vmem:[#allocation87_spill] sm:$0xff] %v3634_v24  ;;  %v1464_v11 = vmax.f32 %v1462_v9, %v3634_v24  ;;  %v3637_v0 = vpop.f32.mrb[53].mxu1 }
 0x314   : > { %4964 = vst [vmem:[#allocation88_spill] sm:$0xff] %v3637_v0  ;;  %v1501_v2 = vmax.f32 %v1499_v46, %v3637_v0 }
 0x316   : > { %v3640_v39 = vpop.f32.mrb[54].mxu1 }
 0x317   : > { %4965 = vst [vmem:[#allocation89_spill] sm:$0xff] %v3640_v39  ;;  %v1465_v59 = vmax.f32 %v1463_v49, %v3640_v39  ;;  %v3643_v30 = vpop.f32.mrb[55].mxu1 }
 0x318   : > { %4966 = vst [vmem:[#allocation90_spill] sm:$0xff] %v3643_v30  ;;  %v1502_v53 = vmax.f32 %v1500_v55, %v3643_v30 }
 0x31a   : > { %v3646_v57 = vpop.f32.mrb[56].mxu1 }
 0x31b   : > { %4967 = vst [vmem:[#allocation91_spill] sm:$0xff] %v3646_v57  ;;  %v1466_v51 = vmax.f32 %v1464_v11, %v3646_v57  ;;  %v3649_v12 = vpop.f32.mrb[57].mxu1 }
 0x31c   : > { %4968 = vst [vmem:[#allocation92_spill] sm:$0xff] %v3649_v12  ;;  %v1503_v9 = vmax.f32 %v1501_v2, %v3649_v12 }
 0x31e   : > { %v3652_v24 = vpop.f32.mrb[58].mxu1 }
 0x31f   : > { %4969 = vst [vmem:[#allocation93_spill] sm:$0xff] %v3652_v24  ;;  %v1467_v46 = vmax.f32 %v1465_v59, %v3652_v24  ;;  %v3655_v0 = vpop.f32.mrb[59].mxu1 }
 0x320   : > { %4970 = vst [vmem:[#allocation94_spill] sm:$0xff] %v3655_v0  ;;  %v1504_v49 = vmax.f32 %v1502_v53, %v3655_v0 }
 0x322   : > { %v3658_v39 = vpop.f32.mrb[60].mxu1 }
 0x323   : > { %4971 = vst [vmem:[#allocation95_spill] sm:$0xff] %v3658_v39  ;;  %v1468_v55 = vmax.f32 %v1466_v51, %v3658_v39  ;;  %v3661_v30 = vpop.f32.mrb[61].mxu1 }
 0x324   : > { %4972 = vst [vmem:[#allocation96_spill] sm:$0xff] %v3661_v30  ;;  %v1505_v11 = vmax.f32 %v1503_v9, %v3661_v30 }
 0x326   : > { %v3664_v57 = vpop.f32.mrb[62].mxu1 }
 0x327   : > { %4973 = vst [vmem:[#allocation97_spill] sm:$0xff] %v3664_v57  ;;  %v1469_v2 = vmax.f32 %v1467_v46, %v3664_v57  ;;  %v3667_v12 = vpop.f32.mrb[63].mxu1  ;;  %v496_v57 = vpop.permute.xlu0 %495 }
 0x328   : > { %4974 = vst [vmem:[#allocation98_spill] sm:$0xff] %v3667_v12  ;;  %v1506_v59 = vmax.f32 %v1504_v49, %v3667_v12 }
 0x32a   : > { %v3670_v24 = vpop.f32.mrb[64].mxu1 }
 0x32b   : > { %4975 = vst [vmem:[#allocation99_spill] sm:$0xff] %v3670_v24  ;;  %v1470_v53 = vmax.f32 %v1468_v55, %v3670_v24  ;;  %v3673_v0 = vpop.f32.mrb[65].mxu1 }
 0x32c   : > { %4976 = vst [vmem:[#allocation100_spill] sm:$0xff] %v3673_v0  ;;  %v1507_v51 = vmax.f32 %v1505_v11, %v3673_v0  ;;  %v506_v11 = vpop.permute.xlu0 %505 }
 0x32e   : > { %v3676_v39 = vpop.f32.mrb[66].mxu1 }
 0x32f   : > { %4977 = vst [vmem:[#allocation101_spill] sm:$0xff] %v3676_v39  ;;  %v1471_v9 = vmax.f32 %v1469_v2, %v3676_v39  ;;  %v3679_v30 = vpop.f32.mrb[67].mxu1 }
 0x330   : > { %4978 = vst [vmem:[#allocation102_spill] sm:$0xff] %v3679_v30  ;;  %v1508_v46 = vmax.f32 %v1506_v59, %v3679_v30  ;;  %v3694_v25 = vpop.permute.xlu0 %515 }
 0x331   : > { %4980 = vst [vmem:[#allocation104_spill] sm:$0xff] %v3694_v25 }
 0x332   : > { %v3682_v56 = vpop.f32.mrb[68].mxu1 }
 0x333   : > { %4979 = vst [vmem:[#allocation103_spill] sm:$0xff] %v3682_v56  ;;  %v1472_v49 = vmax.f32 %v1470_v53, %v3682_v56  ;;  %v3685_v12 = vpop.f32.mrb[69].mxu1 }
 0x334   : > { %v1509_v55 = vmax.f32 %v1507_v51, %v3685_v12  ;;  %v3698_v51 = vadd.f32 %v3092_v62, %v3399_v42  ;;  %v3718_v62 = vadd.f32 %v3128_v14, %v3441_v58  ;;  %v3738_v14 = vadd.f32 %v3205_v47, %v3476_v22 }
 0x336   : > { %v3688_v24 = vpop.f32.mrb[70].mxu1  ;;  %4981 = vst [vmem:[#allocation105_spill] sm:$0xff] %v3738_v14 }
 0x337   : > { %v1473_v0 = vmax.f32 %v1471_v9, %v3688_v24  ;;  %v3691_v61 = vpop.f32.mrb[71].mxu1  ;;  %v3702_v9 = vadd.f32 %v3103_v3, %v3413_v48  ;;  %v3722_v3 = vadd.f32 %v3177_v35, %v3448_v10  ;;  %v3741_v35 = vadd.f32 %v3170_v32, %v496_v57  ;;  %v3743_v48 = vpop.permute.xlu0 %525 }
 0x338   : > { %v1510_v2 = vmax.f32 %v1508_v46, %v3691_v61  ;;  %v3706_v46 = vadd.f32 %v3149_v23, %v3420_v63  ;;  %v3726_v23 = vadd.f32 %v3142_v20, %v3455_v60  ;;  %4982 = vst [vmem:[#allocation106_spill] sm:$0xff] %v3743_v48  ;;  %v3745_v20 = vpop.permute.xlu1 %560  ;;  %v3752_v63 = vadd.f32 %v3219_v54, %v3484_v43 }
 0x339   : > { %v1474_v39 = vmax.f32 %v1472_v49, %v1473_v0  ;;  %v3710_v49 = vadd.f32 %v3114_v8, %v3427_v17  ;;  %v3730_v8 = vadd.f32 %v3191_v41, %v3462_v16  ;;  %4983 = vst [vmem:[#allocation107_spill] sm:$0xff] %v3745_v20  ;;  %v3748_v41 = vadd.f32 %v3175_v34, %v496_v57  ;;  %v4992_v16 = vld [vmem:[#allocation61_spill] sm:$0xff] }
 0x33a   : > { %v1511_v59 = vmax.f32 %v1509_v55, %v1510_v2  ;;  %4985 = vst [vmem:[#allocation109_spill] sm:$0xff] %v3752_v63  ;;  %v3758_v17 = vadd.f32 %v3189_v40, %v506_v11  ;;  %v3762_v32 = vadd.f32 %v3236_v1, %v3490_v28  ;;  %v3772_v54 = vadd.f32 %v3254_v27, %v3496_v36  ;;  %v5000_v55 = vld [vmem:[#allocation77_spill] sm:$0xff]  ;;  %v5001_v2 = vld [vmem:[#allocation79_spill] sm:$0xff] }
 0x33b   : > { %v1475_v30 = vrot.slane %v1474_v39, 4  ;;  %4984 = vst [vmem:[#allocation108_spill] sm:$0xff] %v3748_v41  ;;  %v3780_v40 = vadd.f32 %v3272_v52, %v3745_v20 }
 0x33c   : > { %v1512_v37 = vrot.slane %v1511_v59, 4  ;;  %4986 = vst [vmem:[#allocation110_spill] sm:$0xff] %v3758_v17  ;;  %4987 = vst [vmem:[#allocation111_spill] sm:$0xff] %v3762_v32 }
 0x33d   : > { %v1476_v53 = vmax.f32 %v1474_v39, %v1475_v30  ;;  %v3714_v39 = vadd.f32 %v3163_v29, %v3434_v5  ;;  %v3734_v29 = vadd.f32 %v3156_v26, %v3469_v7  ;;  %v3755_v26 = vadd.f32 %v3184_v38, %v506_v11  ;;  %4989 = vst [vmem:[#allocation113_spill] sm:$0xff] %v3772_v54  ;;  %v4993_v7 = vld [vmem:[#allocation63_spill] sm:$0xff] }
 0x33e   : > { %v1513_v56 = vmax.f32 %v1511_v59, %v1512_v37  ;;  %v3766_v5 = vadd.f32 %v3198_v44, %v3694_v25  ;;  %v3776_v38 = vadd.f32 %v3212_v50, %v3743_v48  ;;  %4991 = vst [vmem:[#allocation115_spill] sm:$0xff] %v3780_v40  ;;  %v5015_v48 = vld [vmem:[#allocation103_spill] sm:$0xff]  ;;  %v5021_v25 = vld [vmem:[#allocation53_spill] sm:$0xff] }
 0x33f   : > { %v1477_v13 = vrot.slane %v1476_v53, 2 }
 0x340   : > { %v1514_v0 = vrot.slane %v1513_v56, 2  ;;  %4988 = vst [vmem:[#allocation112_spill] sm:$0xff] %v3766_v5  ;;  %4990 = vst [vmem:[#allocation114_spill] sm:$0xff] %v3776_v38 }
 0x341   : > { %v1478_v30 = vmax.f32 %v1476_v53, %v1477_v13  ;;  %v5002_v53 = vld [vmem:[#allocation81_spill] sm:$0xff] }
 0x342   : > { %v1515_v42 = vmax.f32 %v1513_v56, %v1514_v0  ;;  %v4999_v56 = vld [vmem:[#allocation75_spill] sm:$0xff] }
 0x343   : > { %v1479_v13 = vrot.slane %v1478_v30, 1 }
 0x344   : > { %v1516_v47 = vrot.slane %v1515_v42, 1 }
 0x345   : > { %v3768_v34 = vmax.f32 %v1478_v30, %v1479_v13  ;;  %v5003_v30 = vld [vmem:[#allocation83_spill] sm:$0xff]  ;;  %v5004_v13 = vld [vmem:[#allocation85_spill] sm:$0xff] }
 0x346   : > { %v3782_v57 = vmax.f32 %v1515_v42, %v1516_v47 }
 0x347   : > { %v1518_v44 = vsub.f32 %v3502_v18, %v3768_v34  ;;  %v1520_v1 = vsub.f32 %v3506_v4, %v3768_v34  ;;  %v1522_v27 = vsub.f32 %v3510_v21, %v3768_v34  ;;  %v1524_v58 = vsub.f32 %v3518_v33, %v3768_v34 }
 0x348   : > { %v1526_v50 = vsub.f32 %v3526_v31, %v3768_v34  ;;  %v1528_v52 = vsub.f32 %v3532_v19, %v3768_v34  ;;  %v1530_v10 = vsub.f32 %v3538_v6, %v3768_v34  ;;  %v1532_v36 = vsub.f32 %v3544_v15, %v3768_v34  ;;  %v4994_v31 = vld [vmem:[#allocation65_spill] sm:$0xff]  ;;  %v4995_v19 = vld [vmem:[#allocation67_spill] sm:$0xff] }
 0x349   : > { %v1534_v60 = vsub.f32 %v3550_v45, %v3768_v34  ;;  %v1536_v21 = vsub.f32 %v4992_v16, %v3768_v34  ;;  %v1538_v37 = vsub.f32 %v4993_v7, %v3768_v34  ;;  %v1540_v22 = vsub.f32 %v4994_v31, %v3768_v34  ;;  %v4996_v6 = vld [vmem:[#allocation69_spill] sm:$0xff]  ;;  %v4997_v15 = vld [vmem:[#allocation71_spill] sm:$0xff] }
 0x34a   : > { %v1542_v4 = vsub.f32 %v4995_v19, %v3768_v34  ;;  %v1544_v43 = vsub.f32 %v4996_v6, %v3768_v34  ;;  %v1546_v28 = vsub.f32 %v4997_v15, %v3768_v34  ;;  %v4998_v45 = vld [vmem:[#allocation73_spill] sm:$0xff]  ;;  %v1550_v33 = vsub.f32 %v4999_v56, %v3768_v34  ;;  %v5005_v16 = vld [vmem:[#allocation87_spill] sm:$0xff]  ;;  %v3832_v6 = vpop.permute.xlu0 %535  ;;  %v3834_v15 = vpop.permute.xlu1 %570 }
 0x34b   : > { %v1548_v18 = vsub.f32 %v4998_v45, %v3768_v34  ;;  %v1552_v11 = vsub.f32 %v5000_v55, %v3768_v34  ;;  %v1554_v59 = vsub.f32 %v5001_v2, %v3768_v34  ;;  %v1556_v0 = vsub.f32 %v5002_v53, %v3768_v34  ;;  %v5006_v31 = vld [vmem:[#allocation89_spill] sm:$0xff]  ;;  %5007 = vst [vmem:[#allocation61_spill] sm:$0xff] %v3832_v6  ;;  %v5009_v45 = vld [vmem:[#allocation91_spill] sm:$0xff] }
 0x34c   : > { %v1558_v42 = vsub.f32 %v5003_v30, %v3768_v34  ;;  %v1560_v47 = vsub.f32 %v5004_v13, %v3768_v34  ;;  %v1562_v7 = vsub.f32 %v5005_v16, %v3768_v34  ;;  %v1564_v19 = vsub.f32 %v5006_v31, %v3768_v34  ;;  %5008 = vst [vmem:[#allocation63_spill] sm:$0xff] %v3834_v15  ;;  %v5010_v55 = vld [vmem:[#allocation93_spill] sm:$0xff]  ;;  %v5011_v53 = vld [vmem:[#allocation95_spill] sm:$0xff] }
 0x34d   : > { %v1566_v56 = vsub.f32 %v5009_v45, %v3768_v34  ;;  %v1568_v2 = vsub.f32 %v5010_v55, %v3768_v34  ;;  %v1570_v30 = vsub.f32 %v5011_v53, %v3768_v34  ;;  %v5012_v13 = vld [vmem:[#allocation97_spill] sm:$0xff]  ;;  %v5013_v16 = vld [vmem:[#allocation99_spill] sm:$0xff]  ;;  %v1582_v40 = vmul.f32 1.442695, %v1518_v44 }
 0x34e   : > { %v1572_v20 = vsub.f32 %v5012_v13, %v3768_v34  ;;  %v1574_v17 = vsub.f32 %v5013_v16, %v3768_v34  ;;  %v5014_v31 = vld [vmem:[#allocation101_spill] sm:$0xff]  ;;  %v1586_v55 = vmul.f32 1.442695, %v1520_v1  ;;  %v1590_v54 = vmul.f32 1.442695, %v1522_v27  ;;  %v5017_v13 = vld [vmem:[#allocation11_spill] sm:$0xff] }
 0x34f   : > { %v1576_v41 = vsub.f32 %v5014_v31, %v3768_v34  ;;  %v3856_v63 = vadd.f32 %v5017_v13, %v3832_v6  ;;  %v5019_v16 = vld [vmem:[#allocation20_spill] sm:$0xff]  ;;  %v1594_v31 = vmul.f32 1.442695, %v1524_v58  ;;  %2437 = vpow2.f32 %v1582_v40 }
 0x350   : > { %v3860_v38 = vadd.f32 %v5019_v16, %v3834_v15  ;;  %v1598_v45 = vmul.f32 1.442695, %v1526_v50  ;;  %v1602_v44 = vmul.f32 1.442695, %v1528_v52  ;;  %v1606_v1 = vmul.f32 1.442695, %v1530_v10 }
 0x351   : > { %5018 = vst [vmem:[#allocation65_spill] sm:$0xff] %v3856_v63  ;;  %2439 = vpow2.f32 %v1586_v55  ;;  %v1610_v27 = vmul.f32 1.442695, %v1532_v36  ;;  %v1614_v5 = vmul.f32 1.442695, %v1534_v60  ;;  %v5037_v55 = vld [vmem:[#allocation70_spill] sm:$0xff] }
 0x352   : > { %5020 = vst [vmem:[#allocation67_spill] sm:$0xff] %v3860_v38  ;;  %v1618_v32 = vmul.f32 1.442695, %v1536_v21  ;;  %2441 = vpow2.f32 %v1590_v54  ;;  %v1622_v53 = vmul.f32 1.442695, %v1538_v37 }
 0x353   : > { %v1626_v13 = vmul.f32 1.442695, %v1540_v22  ;;  %v1630_v6 = vmul.f32 1.442695, %v1542_v4  ;;  %2443 = vpow2.f32 %v1594_v31  ;;  %v1634_v63 = vmul.f32 1.442695, %v1544_v43  ;;  %v3909_v31 = vpop.permute.xlu0 %545 }
 0x354   : > { %v1638_v16 = vmul.f32 1.442695, %v1546_v28  ;;  %v1642_v15 = vmul.f32 1.442695, %v1548_v18  ;;  %2445 = vpow2.f32 %v1598_v45  ;;  %v1646_v58 = vmul.f32 1.442695, %v1550_v33 }
 0x355   : > { %v1650_v38 = vmul.f32 1.442695, %v1552_v11  ;;  %v3864_v14 = vmul.f32 1.442695, %v1554_v59  ;;  %2447 = vpow2.f32 %v1602_v44  ;;  %v3866_v40 = vmul.f32 1.442695, %v1556_v0 }
 0x356   : > { %v3868_v50 = vmul.f32 1.442695, %v1558_v42  ;;  %v3870_v52 = vmul.f32 1.442695, %v1560_v47  ;;  %2449 = vpow2.f32 %v1606_v1  ;;  %v3872_v54 = vmul.f32 1.442695, %v1562_v7 }
 0x357   : > { %v3874_v10 = vmul.f32 1.442695, %v1564_v19  ;;  %v3876_v36 = vmul.f32 1.442695, %v1566_v56  ;;  %2451 = vpow2.f32 %v1610_v27  ;;  %v3878_v60 = vmul.f32 1.442695, %v1568_v2 }
 0x358   : > { %v3880_v21 = vmul.f32 1.442695, %v1570_v30  ;;  %v3882_v37 = vmul.f32 1.442695, %v1572_v20  ;;  %2453 = vpow2.f32 %v1614_v5  ;;  %v3884_v22 = vmul.f32 1.442695, %v1574_v17 }
 0x359   : > { %v3886_v4 = vmul.f32 1.442695, %v1576_v41  ;;  %v5022_v43 = vld [vmem:[#allocation54_spill] sm:$0xff]  ;;  %2455 = vpow2.f32 %v1618_v32  ;;  %v5023_v18 = vld [vmem:[#allocation55_spill] sm:$0xff]  ;;  %v5024_v11 = vld [vmem:[#allocation56_spill] sm:$0xff]  ;;  %v2438_v20 = vpop.eup %2437 }
 0x35a   : > { %v5025_v0 = vld [vmem:[#allocation57_spill] sm:$0xff]  ;;  %2457 = vpow2.f32 %v1622_v53  ;;  %v5026_v17 = vld [vmem:[#allocation58_spill] sm:$0xff]  ;;  %v5027_v41 = vld [vmem:[#allocation59_spill] sm:$0xff]  ;;  %v3903_v56 = vmul.f32 %v2438_v20, %v3698_v51 }
 0x35b   : > { %v5028_v7 = vld [vmem:[#allocation60_spill] sm:$0xff]  ;;  %v2440_v19 = vpop.eup %2439  ;;  %2459 = vpow2.f32 %v1626_v13  ;;  %v5030_v2 = vld [vmem:[#allocation62_spill] sm:$0xff] }
 0x35c   : > { %5029 = vst [vmem:[#allocation69_spill] sm:$0xff] %v3903_v56  ;;  %v5031_v45 = vld [vmem:[#allocation64_spill] sm:$0xff]  ;;  %v2442_v53 = vpop.eup %2441  ;;  %2461 = vpow2.f32 %v1630_v6  ;;  %v1710_v44 = vadd.f32 %v2440_v19, %v2438_v20  ;;  %v5032_v1 = vld [vmem:[#allocation30_spill] sm:$0xff] }
 0x35d   : > { %v3912_v27 = vmul.f32 %v2440_v19, %v5032_v1  ;;  %v5034_v32 = vld [vmem:[#allocation66_spill] sm:$0xff]  ;;  %v2444_v47 = vpop.eup %2443  ;;  %2463 = vpow2.f32 %v1634_v63  ;;  %v3917_v51 = vmul.f32 %v2442_v53, %v3702_v9  ;;  %v5036_v30 = vld [vmem:[#allocation68_spill] sm:$0xff] }
 0x35e   : > { %v2446_v59 = vpop.eup %2445  ;;  %2465 = vpow2.f32 %v1638_v16  ;;  %v1711_v6 = vadd.f32 %v2442_v53, %v1710_v44  ;;  %v5038_v20 = vld [vmem:[#allocation32_spill] sm:$0xff]  ;;  %v5042_v63 = vld [vmem:[#allocation74_spill] sm:$0xff] }
 0x35f   : > { %5033 = vst [vmem:[#allocation71_spill] sm:$0xff] %v3912_v27  ;;  %5035 = vst [vmem:[#allocation73_spill] sm:$0xff] %v3917_v51  ;;  %v3924_v19 = vmul.f32 %v2444_v47, %v5038_v20  ;;  %v5040_v1 = vld [vmem:[#allocation72_spill] sm:$0xff]  ;;  %v2448_v33 = vpop.eup %2447  ;;  %2467 = vpow2.f32 %v1642_v15  ;;  %v3929_v9 = vmul.f32 %v2446_v59, %v3710_v49  ;;  %v5044_v53 = vld [vmem:[#allocation34_spill] sm:$0xff] }
 0x360   : > { %v5043_v28 = vld [vmem:[#allocation76_spill] sm:$0xff]  ;;  %v2450_v51 = vpop.eup %2449  ;;  %2469 = vpow2.f32 %v1646_v58  ;;  %v1712_v16 = vadd.f32 %v2444_v47, %v1711_v6  ;;  %v3936_v44 = vmul.f32 %v2448_v33, %v5044_v53  ;;  %v5046_v20 = vld [vmem:[#allocation78_spill] sm:$0xff]  ;;  %v3947_v58 = vpop.permute.xlu0 %555  ;;  %v5050_v6 = vld [vmem:[#allocation37_spill] sm:$0xff] }
 0x361   : > { %5039 = vst [vmem:[#allocation75_spill] sm:$0xff] %v3924_v19  ;;  %5041 = vst [vmem:[#allocation77_spill] sm:$0xff] %v3929_v9  ;;  %v2452_v19 = vpop.eup %2451  ;;  %2471 = vpow2.f32 %v1650_v38  ;;  %v3941_v49 = vmul.f32 %v2450_v51, %v3718_v62  ;;  %v5048_v15 = vld [vmem:[#allocation80_spill] sm:$0xff]  ;;  %v5049_v9 = vld [vmem:[#allocation82_spill] sm:$0xff] }
 0x362   : > { %5045 = vst [vmem:[#allocation79_spill] sm:$0xff] %v3936_v44  ;;  %v2454_v27 = vpop.eup %2453  ;;  %2473 = vpow2.f32 %v3864_v14  ;;  %v1713_v47 = vadd.f32 %v2446_v59, %v1712_v16  ;;  %v3951_v53 = vmul.f32 %v2452_v19, %v5050_v6  ;;  %v5052_v38 = vld [vmem:[#allocation84_spill] sm:$0xff]  ;;  %v5054_v42 = vld [vmem:[#allocation86_spill] sm:$0xff] }
 0x363   : > { %5047 = vst [vmem:[#allocation81_spill] sm:$0xff] %v3941_v49  ;;  %v2456_v62 = vpop.eup %2455  ;;  %2475 = vpow2.f32 %v3866_v40  ;;  %v3957_v5 = vmul.f32 %v2454_v27, %v3726_v23  ;;  %v5055_v44 = vld [vmem:[#allocation88_spill] sm:$0xff]  ;;  %v5057_v6 = vld [vmem:[#allocation90_spill] sm:$0xff] }
 0x364   : > { %5051 = vst [vmem:[#allocation83_spill] sm:$0xff] %v3951_v53  ;;  %v2458_v14 = vpop.eup %2457  ;;  %2477 = vpow2.f32 %v3868_v50  ;;  %v1714_v59 = vadd.f32 %v2448_v33, %v1713_v47  ;;  %v3965_v16 = vmul.f32 %v2456_v62, %v3706_v46  ;;  %v5059_v49 = vld [vmem:[#allocation92_spill] sm:$0xff]  ;;  %v5060_v56 = vld [vmem:[#allocation94_spill] sm:$0xff] }
 0x365   : > { %5053 = vst [vmem:[#allocation85_spill] sm:$0xff] %v3957_v5  ;;  %v2460_v40 = vpop.eup %2459  ;;  %2479 = vpow2.f32 %v3870_v52  ;;  %v3971_v23 = vmul.f32 %v2458_v14, %v3734_v29  ;;  %v5062_v47 = vld [vmem:[#allocation96_spill] sm:$0xff]  ;;  %v5064_v53 = vld [vmem:[#allocation98_spill] sm:$0xff] }
 0x366   : > { %5056 = vst [vmem:[#allocation87_spill] sm:$0xff] %v3965_v16  ;;  %v3977_v50 = vpop.eup %2461  ;;  %2481 = vpow2.f32 %v3872_v54  ;;  %v1715_v46 = vadd.f32 %v2450_v51, %v1714_v59  ;;  %v3981_v33 = vmul.f32 %v2460_v40, %v3714_v39  ;;  %v5065_v54 = vld [vmem:[#allocation100_spill] sm:$0xff]  ;;  %v3998_v39 = vpop.permute.xlu1 %580 }
 0x367   : > { %5058 = vst [vmem:[#allocation89_spill] sm:$0xff] %v3971_v23  ;;  %v3985_v13 = vpop.eup %2463  ;;  %2483 = vpow2.f32 %v3874_v10  ;;  %v3990_v29 = vmul.f32 %v3977_v50, %v3741_v35  ;;  %5066 = vst [vmem:[#allocation95_spill] sm:$0xff] %v3998_v39  ;;  %v5068_v35 = vld [vmem:[#allocation102_spill] sm:$0xff]  ;;  %v5072_v23 = vld [vmem:[#allocation13_spill] sm:$0xff] }
 0x368   : > { %5061 = vst [vmem:[#allocation91_spill] sm:$0xff] %v3981_v33  ;;  %v3996_v59 = vpop.eup %2465  ;;  %v4000_v33 = vpop.permute.xlu0 %565  ;;  %2485 = vpow2.f32 %v3876_v36  ;;  %v1716_v52 = vadd.f32 %v2452_v19, %v1715_v46  ;;  %v4005_v10 = vmul.f32 %v3985_v13, %v3722_v3  ;;  %v5070_v3 = vsub.f32 %v5015_v48, %v3768_v34 }
 0x369   : > { %5063 = vst [vmem:[#allocation93_spill] sm:$0xff] %v3990_v29  ;;  %v4009_v5 = vpop.eup %2467  ;;  %2487 = vpow2.f32 %v3878_v60  ;;  %v4014_v51 = vmul.f32 %v3996_v59, %v3755_v26  ;;  %v5073_v36 = vsub.f32 %v3688_v24, %v3768_v34  ;;  %v5080_v24 = vld [vmem:[#allocation24_spill] sm:$0xff] }
 0x36a   : > { %5067 = vst [vmem:[#allocation97_spill] sm:$0xff] %v4005_v10  ;;  %v4020_v19 = vpop.eup %2469  ;;  %2489 = vpow2.f32 %v3880_v21  ;;  %v1702_v46 = vmul.f32 1.442695, %v5070_v3  ;;  %v1717_v29 = vadd.f32 %v2454_v27, %v1716_v52  ;;  %v4028_v60 = vmul.f32 %v4009_v5, %v3730_v8  ;;  %v5074_v10 = vld [vmem:[#allocation112_spill] sm:$0xff]  ;;  %v5076_v52 = vld [vmem:[#allocation105_spill] sm:$0xff] }
 0x36b   : > { %5069 = vst [vmem:[#allocation99_spill] sm:$0xff] %v4014_v51  ;;  %v4030_v26 = vpop.eup %2471  ;;  %v978_v51 = vadd.f32 %v5072_v23, %v3909_v31  ;;  %2491 = vpow2.f32 %v3882_v37  ;;  %v1706_v21 = vmul.f32 1.442695, %v5073_v36  ;;  %v4040_v48 = vmul.f32 %v4020_v19, %v5074_v10  ;;  %v5078_v23 = vld [vmem:[#allocation52_spill] sm:$0xff]  ;;  %v5081_v10 = vld [vmem:[#allocation114_spill] sm:$0xff] }
 0x36c   : > { %5071 = vst [vmem:[#allocation101_spill] sm:$0xff] %v4028_v60  ;;  %v4042_v27 = vpop.eup %2473  ;;  %2493 = vpow2.f32 %v3884_v22  ;;  %v1718_v8 = vadd.f32 %v2456_v62, %v1717_v29  ;;  %v4047_v3 = vmul.f32 %v4030_v26, %v5076_v52  ;;  %v5079_v37 = vsub.f32 %v5078_v23, %v3782_v57  ;;  %v4066_v52 = vpop.permute.xlu1 %590 }
 0x36d   : > { %5075 = vst [vmem:[#allocation103_spill] sm:$0xff] %v4040_v48  ;;  %v4052_v16 = vpop.eup %2475  ;;  %v1012_v34 = vadd.f32 %v5080_v24, %v3998_v39  ;;  %2495 = vpow2.f32 %v3886_v4  ;;  %v4059_v36 = vmul.f32 %v4042_v27, %v5081_v10  ;;  %v5083_v22 = vsub.f32 %v5021_v25, %v3782_v57  ;;  %v4068_v23 = vpop.permute.xlu0 %575  ;;  %v5087_v25 = vld [vmem:[#allocation15_spill] sm:$0xff]  ;;  %v5088_v48 = vld [vmem:[#allocation65_spill] sm:$0xff] }
 0x36e   : > { %5077 = vst [vmem:[#allocation11_spill] sm:$0xff] %v4047_v3  ;;  %v1584_v60 = vmul.f32 1.442695, %v5079_v37  ;;  %v4064_v29 = vpop.eup %2477  ;;  %2497 = vpow2.f32 %v1702_v46  ;;  %v1719_v37 = vadd.f32 %v2458_v14, %v1718_v8  ;;  %v5084_v3 = vld [vmem:[#allocation109_spill] sm:$0xff]  ;;  %v5086_v4 = vsub.f32 %v5022_v43, %v3782_v57 }
 0x36f   : > { %5082 = vst [vmem:[#allocation20_spill] sm:$0xff] %v4059_v36  ;;  %v1588_v62 = vmul.f32 1.442695, %v5083_v22  ;;  %v4072_v24 = vmul.f32 %v4052_v16, %v5084_v3  ;;  %v4077_v36 = vpop.eup %2479  ;;  %v988_v22 = vadd.f32 %v5087_v25, %v3947_v58  ;;  %2499 = vpow2.f32 %v1706_v21 }
 0x370   : > { %v1592_v10 = vmul.f32 1.442695, %v5086_v4  ;;  %v4083_v39 = vmul.f32 %v4064_v29, %v5088_v48  ;;  %v5090_v14 = vsub.f32 %v5023_v18, %v3782_v57  ;;  %v4088_v8 = vpop.eup %2481  ;;  %v1720_v3 = vadd.f32 %v2460_v40, %v1719_v37  ;;  %v5093_v48 = vld [vmem:[#allocation28_spill] sm:$0xff] }
 0x371   : > { %5085 = vst [vmem:[#allocation53_spill] sm:$0xff] %v4072_v24  ;;  %v5091_v24 = vld [vmem:[#allocation111_spill] sm:$0xff]  ;;  %2501 = vpow2.f32 %v1584_v60  ;;  %v5092_v4 = vsub.f32 %v5024_v11, %v3782_v57  ;;  %v4097_v25 = vpop.eup %2483  ;;  %v4102_v18 = vmul.f32 %v4088_v8, %v978_v51  ;;  %v5095_v40 = vsub.f32 %v5025_v0, %v3782_v57 }
 0x372   : > { %5089 = vst [vmem:[#allocation54_spill] sm:$0xff] %v4083_v39  ;;  %v1596_v46 = vmul.f32 1.442695, %v5090_v14  ;;  %v4092_v43 = vmul.f32 %v4077_v36, %v5091_v24  ;;  %v1022_v39 = vadd.f32 %v5093_v48, %v4066_v52  ;;  %2503 = vpow2.f32 %v1588_v62  ;;  %v4107_v24 = vpop.eup %2485  ;;  %v5096_v14 = vld [vmem:[#allocation113_spill] sm:$0xff]  ;;  %v5098_v62 = vld [vmem:[#allocation18_spill] sm:$0xff] }
 0x373   : > { %v1600_v21 = vmul.f32 1.442695, %v5092_v4  ;;  %5094 = vst [vmem:[#allocation55_spill] sm:$0xff] %v4102_v18  ;;  %v1604_v37 = vmul.f32 1.442695, %v5095_v40  ;;  %v1721_v60 = vadd.f32 %v3977_v50, %v1720_v3  ;;  %v4112_v11 = vmul.f32 %v4097_v25, %v5096_v14  ;;  %v4117_v51 = vpop.eup %2487  ;;  %v5101_v14 = vld [vmem:[#allocation115_spill] sm:$0xff] }
 0x374   : > { %2505 = vpow2.f32 %v1592_v10  ;;  %v5097_v4 = vsub.f32 %v5026_v17, %v3782_v57  ;;  %v998_v18 = vadd.f32 %v5098_v62, %v4000_v33  ;;  %v4122_v0 = vmul.f32 %v4107_v24, %v988_v22  ;;  %v4127_v40 = vpop.eup %2489  ;;  %v4129_v10 = vpop.permute.xlu0 %585 }
 0x375   : > { %2507 = vpow2.f32 %v1596_v46  ;;  %v5100_v50 = vsub.f32 %v5027_v41, %v3782_v57  ;;  %v1722_v17 = vadd.f32 %v3985_v13, %v1721_v60  ;;  %v5103_v22 = vsub.f32 %v5028_v7, %v3782_v57  ;;  %v4139_v46 = vpop.eup %2491  ;;  %v5104_v41 = vld [vmem:[#allocation22_spill] sm:$0xff] }
 0x376   : > { %v1608_v48 = vmul.f32 1.442695, %v5097_v4  ;;  %5099 = vst [vmem:[#allocation56_spill] sm:$0xff] %v4122_v0  ;;  %v4134_v4 = vmul.f32 %v4117_v51, %v5101_v14  ;;  %2509 = vpow2.f32 %v1600_v21  ;;  %v4144_v0 = vmul.f32 %v4127_v40, %v998_v18  ;;  %v4149_v14 = vpop.eup %2493 }
 0x377   : > { %v1612_v3 = vmul.f32 1.442695, %v5100_v50  ;;  %v1616_v62 = vmul.f32 1.442695, %v5103_v22  ;;  %v1008_v50 = vadd.f32 %v5104_v41, %v4068_v23  ;;  %2511 = vpow2.f32 %v1604_v37  ;;  %v4159_v18 = vpop.eup %2495  ;;  %v5110_v37 = vld [vmem:[#allocation26_spill] sm:$0xff] }
 0x378   : > { %5102 = vst [vmem:[#allocation57_spill] sm:$0xff] %v4134_v4  ;;  %5105 = vst [vmem:[#allocation58_spill] sm:$0xff] %v4144_v0  ;;  %v5106_v13 = vsub.f32 %v5030_v2, %v3782_v57  ;;  %v1723_v21 = vadd.f32 %v3996_v59, %v1722_v17  ;;  %v5107_v4 = vld [vmem:[#allocation67_spill] sm:$0xff]  ;;  %2513 = vpow2.f32 %v1608_v48  ;;  %v5109_v22 = vsub.f32 %v5031_v45, %v3782_v57 }
 0x379   : > { %v4154_v7 = vmul.f32 %v4139_v46, %v5107_v4  ;;  %v1018_v0 = vadd.f32 %v5110_v37, %v4129_v10  ;;  %v4164_v2 = vmul.f32 %v4149_v14, %v1008_v50  ;;  %2515 = vpow2.f32 %v1612_v3  ;;  %v4169_v4 = vpop.eup %2497  ;;  %v5115_v50 = vld [vmem:[#allocation104_spill] sm:$0xff]  ;;  %v5116_v3 = vld [vmem:[#allocation9_spill] sm:$0xff] }
 0x37a   : > { %v1620_v60 = vmul.f32 1.442695, %v5106_v13  ;;  %v1624_v41 = vmul.f32 1.442695, %v5109_v22  ;;  %v5112_v59 = vsub.f32 %v5034_v32, %v3782_v57  ;;  %v1724_v48 = vadd.f32 %v4009_v5, %v1723_v21  ;;  %v4178_v37 = vpop.eup %2499 }
 0x37b   : > { %5108 = vst [vmem:[#allocation59_spill] sm:$0xff] %v4154_v7  ;;  %5111 = vst [vmem:[#allocation60_spill] sm:$0xff] %v4164_v2  ;;  %v4173_v45 = vmul.f32 %v4159_v18, %v1012_v34  ;;  %2517 = vpow2.f32 %v1616_v62  ;;  %v5114_v13 = vsub.f32 %v5036_v30, %v3782_v57  ;;  %v4182_v2 = vadd.f32 %v5116_v3, %v5115_v50  ;;  %v2502_v21 = vpop.eup %2501  ;;  %v5120_v3 = vld [vmem:[#allocation106_spill] sm:$0xff] }
 0x37c   : > { %v1628_v17 = vmul.f32 1.442695, %v5112_v59  ;;  %v4185_v32 = vmul.f32 %v4169_v4, %v1018_v0  ;;  %2519 = vpow2.f32 %v1620_v60  ;;  %v5118_v5 = vsub.f32 %v5037_v55, %v3782_v57  ;;  %v2504_v50 = vpop.eup %2503  ;;  %v5121_v0 = vld [vmem:[#allocation10_spill] sm:$0xff] }
 0x37d   : > { %5113 = vst [vmem:[#allocation62_spill] sm:$0xff] %v4173_v45  ;;  %v1632_v22 = vmul.f32 1.442695, %v5114_v13  ;;  %v1725_v62 = vadd.f32 %v4020_v19, %v1724_v48  ;;  %v4192_v30 = vmul.f32 %v4178_v37, %v1022_v39  ;;  %2521 = vpow2.f32 %v1624_v41  ;;  %v5131_v45 = vld [vmem:[#allocation33_spill] sm:$0xff] }
 0x37e   : > { %5117 = vst [vmem:[#allocation64_spill] sm:$0xff] %v4185_v32  ;;  %v1636_v34 = vmul.f32 1.442695, %v5118_v5  ;;  %v5119_v59 = vsub.f32 %v5040_v1, %v3782_v57  ;;  %v4199_v32 = vadd.f32 %v5121_v0, %v5120_v3  ;;  %2523 = vpow2.f32 %v1628_v17  ;;  %v2506_v48 = vpop.eup %2505 }
 0x37f   : > { %v5122_v55 = vsub.f32 %v5042_v63, %v3782_v57  ;;  %v5123_v19 = vsub.f32 %v5043_v28, %v3782_v57  ;;  %v1726_v41 = vadd.f32 %v4030_v26, %v1725_v62  ;;  %2525 = vpow2.f32 %v1632_v22  ;;  %v2508_v3 = vpop.eup %2507 }
 0x380   : > { %v1640_v13 = vmul.f32 1.442695, %v5119_v59  ;;  %v5124_v1 = vsub.f32 %v5046_v20, %v3782_v57  ;;  %v5125_v59 = vsub.f32 %v5048_v15, %v3782_v57  ;;  %2527 = vpow2.f32 %v1636_v34  ;;  %v2510_v22 = vpop.eup %2509  ;;  %v5128_v20 = vld [vmem:[#allocation36_spill] sm:$0xff]  ;;  %v5129_v15 = vld [vmem:[#allocation31_spill] sm:$0xff] }
 0x381   : > { %v1644_v60 = vmul.f32 1.442695, %v5122_v55  ;;  %v1648_v39 = vmul.f32 1.442695, %v5123_v19  ;;  %v5126_v63 = vsub.f32 %v5049_v9, %v3782_v57  ;;  %v5127_v28 = vsub.f32 %v5052_v38, %v3782_v57  ;;  %v2512_v34 = vpop.eup %2511  ;;  %v5130_v9 = vld [vmem:[#allocation39_spill] sm:$0xff] }
 0x382   : > { %v1652_v5 = vmul.f32 1.442695, %v5124_v1  ;;  %v1656_v17 = vmul.f32 1.442695, %v5125_v59  ;;  %v1747_v26 = vadd.f32 %v2504_v50, %v2502_v21  ;;  %v1727_v62 = vadd.f32 %v4042_v27, %v1726_v41  ;;  %v5132_v27 = vld [vmem:[#allocation41_spill] sm:$0xff] }
 0x383   : > { %v1660_v0 = vmul.f32 1.442695, %v5126_v63  ;;  %v1664_v55 = vmul.f32 1.442695, %v5127_v28  ;;  %2529 = vpow2.f32 %v1640_v13  ;;  %v4222_v19 = vmul.f32 %v2502_v21, %v5128_v20  ;;  %v2514_v28 = vpop.eup %2513  ;;  %v5133_v21 = vld [vmem:[#allocation35_spill] sm:$0xff] }
 0x384   : > { %v4225_v1 = vmul.f32 %v2504_v50, %v5129_v15  ;;  %2531 = vpow2.f32 %v1644_v60  ;;  %v1748_v59 = vadd.f32 %v2506_v48, %v1747_v26  ;;  %v4228_v63 = vmul.f32 %v2506_v48, %v5130_v9  ;;  %v2516_v50 = vpop.eup %2515  ;;  %v5135_v20 = vld [vmem:[#allocation43_spill] sm:$0xff]  ;;  %v5137_v9 = vld [vmem:[#allocation38_spill] sm:$0xff] }
 0x385   : > { %v4231_v38 = vmul.f32 %v2508_v3, %v5131_v45  ;;  %v1728_v7 = vadd.f32 %v4052_v16, %v1727_v62  ;;  %2533 = vpow2.f32 %v1648_v39  ;;  %v4235_v13 = vmul.f32 %v2510_v22, %v5132_v27  ;;  %v2518_v15 = vpop.eup %2517 }
 0x386   : > { %v4238_v41 = vmul.f32 %v2512_v34, %v5133_v21  ;;  %2535 = vpow2.f32 %v1652_v5  ;;  %v5134_v60 = vsub.f32 %v5054_v42, %v3782_v57  ;;  %v1749_v26 = vadd.f32 %v2508_v3, %v1748_v59  ;;  %v2520_v5 = vpop.eup %2519  ;;  %v5139_v21 = vld [vmem:[#allocation45_spill] sm:$0xff] }
 0x387   : > { %v4244_v45 = vmul.f32 %v2514_v28, %v5135_v20  ;;  %v1729_v16 = vadd.f32 %v4064_v29, %v1728_v7  ;;  %2537 = vpow2.f32 %v1656_v17  ;;  %v5136_v39 = vsub.f32 %v5055_v44, %v3782_v57  ;;  %v2522_v20 = vpop.eup %2521  ;;  %v5141_v17 = vld [vmem:[#allocation40_spill] sm:$0xff] }
 0x388   : > { %v1668_v48 = vmul.f32 1.442695, %v5134_v60  ;;  %v4251_v27 = vmul.f32 %v2516_v50, %v5137_v9  ;;  %2539 = vpow2.f32 %v1660_v0  ;;  %v5138_v42 = vsub.f32 %v5057_v6, %v3782_v57  ;;  %v2524_v0 = vpop.eup %2523  ;;  %v5143_v9 = vld [vmem:[#allocation47_spill] sm:$0xff] }
 0x389   : > { %v1672_v62 = vmul.f32 1.442695, %v5136_v39  ;;  %v1750_v59 = vadd.f32 %v2510_v22, %v1749_v26  ;;  %v4257_v60 = vmul.f32 %v2518_v15, %v5139_v21  ;;  %v1730_v29 = vadd.f32 %v4077_v36, %v1729_v16  ;;  %v2526_v21 = vpop.eup %2525  ;;  %v5145_v16 = vld [vmem:[#allocation42_spill] sm:$0xff] }
 0x38a   : > { %v1676_v3 = vmul.f32 1.442695, %v5138_v42  ;;  %2541 = vpow2.f32 %v1664_v55  ;;  %v5140_v44 = vsub.f32 %v5059_v49, %v3782_v57  ;;  %v4264_v39 = vmul.f32 %v2520_v5, %v5141_v17  ;;  %v5147_v17 = vld [vmem:[#allocation108_spill] sm:$0xff] }
 0x38b   : > { %2543 = vpow2.f32 %v1668_v48  ;;  %v5142_v6 = vsub.f32 %v5060_v56, %v3782_v57  ;;  %v1751_v26 = vadd.f32 %v2512_v34, %v1750_v59  ;;  %v4270_v42 = vmul.f32 %v2522_v20, %v5143_v9  ;;  %v4279_v48 = vpop.eup %2527  ;;  %v5149_v9 = vld [vmem:[#allocation44_spill] sm:$0xff] }
 0x38c   : > { %v1680_v7 = vmul.f32 1.442695, %v5140_v44  ;;  %v1731_v36 = vadd.f32 %v4088_v8, %v1730_v29  ;;  %2545 = vpow2.f32 %v1672_v62  ;;  %v5144_v49 = vsub.f32 %v5062_v47, %v3782_v57 }
 0x38d   : > { %v1684_v22 = vmul.f32 1.442695, %v5142_v6  ;;  %v4277_v44 = vmul.f32 %v2524_v0, %v5145_v16  ;;  %2547 = vpow2.f32 %v1676_v3  ;;  %v5146_v56 = vsub.f32 %v5064_v53, %v3782_v57  ;;  %v4287_v8 = vpop.eup %2529  ;;  %v5151_v16 = vld [vmem:[#allocation110_spill] sm:$0xff] }
 0x38e   : > { %v1688_v55 = vmul.f32 1.442695, %v5144_v49  ;;  %v1752_v59 = vadd.f32 %v2514_v28, %v1751_v26  ;;  %v4285_v6 = vmul.f32 %v2526_v21, %v5147_v17  ;;  %v1732_v62 = vadd.f32 %v4097_v25, %v1731_v36  ;;  %v4297_v49 = vpop.eup %2531  ;;  %v5153_v17 = vld [vmem:[#allocation46_spill] sm:$0xff] }
 0x38f   : > { %v1692_v34 = vmul.f32 1.442695, %v5146_v56  ;;  %2549 = vpow2.f32 %v1680_v7  ;;  %v5148_v47 = vsub.f32 %v5065_v54, %v3782_v57  ;;  %v4295_v3 = vmul.f32 %v4279_v48, %v5149_v9  ;;  %v4306_v7 = vpop.eup %2533 }
 0x390   : > { %2551 = vpow2.f32 %v1684_v22  ;;  %v5150_v53 = vsub.f32 %v5068_v35, %v3782_v57  ;;  %v1753_v26 = vadd.f32 %v2516_v50, %v1752_v59  ;;  %v4304_v25 = vmul.f32 %v4287_v8, %v5151_v16  ;;  %v4316_v35 = vpop.eup %2535  ;;  %v5159_v16 = vld [vmem:[#allocation61_spill] sm:$0xff] }
 0x391   : > { %v1696_v29 = vmul.f32 1.442695, %v5148_v47  ;;  %v1733_v54 = vadd.f32 %v4107_v24, %v1732_v62  ;;  %2553 = vpow2.f32 %v1688_v55  ;;  %v5152_v36 = vsub.f32 %v3685_v12, %v3782_v57  ;;  %v2538_v55 = vpop.eup %2537  ;;  %v5157_v62 = vld [vmem:[#allocation48_spill] sm:$0xff] }
 0x392   : > { %v1700_v28 = vmul.f32 1.442695, %v5150_v53  ;;  %v4314_v22 = vmul.f32 %v4297_v49, %v5153_v17  ;;  %2555 = vpow2.f32 %v1692_v34  ;;  %v5155_v50 = vsub.f32 %v3691_v61, %v3782_v57  ;;  %v2540_v53 = vpop.eup %2539  ;;  %v5160_v34 = vld [vmem:[#allocation12_spill] sm:$0xff] }
 0x393   : > { %v1704_v56 = vmul.f32 1.442695, %v5152_v36  ;;  %v1754_v47 = vadd.f32 %v2518_v15, %v1753_v26  ;;  %v4323_v24 = vmul.f32 %v4306_v7, %v4182_v2  ;;  %v1734_v12 = vadd.f32 %v4117_v51, %v1733_v54  ;;  %v5162_v26 = vld [vmem:[#allocation49_spill] sm:$0xff]  ;;  %v5164_v54 = vld [vmem:[#allocation14_spill] sm:$0xff] }
 0x394   : > { %5154 = vst [vmem:[#allocation30_spill] sm:$0xff] %v4314_v22  ;;  %v1708_v59 = vmul.f32 1.442695, %v5155_v50  ;;  %2557 = vpow2.f32 %v1696_v29  ;;  %v4328_v9 = vmul.f32 %v4316_v35, %v5157_v62  ;;  %v970_v36 = vadd.f32 %v5160_v34, %v5159_v16  ;;  %v2542_v15 = vpop.eup %2541  ;;  %v2577_v22 = vld [vmem:[%s2877_s16 + $0x70] sm:$0xff] }
 0x395   : > { %5156 = vst [vmem:[#allocation66_spill] sm:$0xff] %v4323_v24  ;;  %2559 = vpow2.f32 %v1700_v28  ;;  %v1755_v61 = vadd.f32 %v2520_v5, %v1754_v47  ;;  %v4333_v57 = vmul.f32 %v2538_v55, %v4199_v32  ;;  %v1735_v2 = vadd.f32 %v4127_v40, %v1734_v12  ;;  %v2544_v29 = vpop.eup %2543  ;;  %v5166_v32 = vld [vmem:[#allocation50_spill] sm:$0xff]  ;;  %v5168_v40 = vld [vmem:[#allocation16_spill] sm:$0xff] }
 0x396   : > { %5158 = vst [vmem:[#allocation68_spill] sm:$0xff] %v4328_v9  ;;  %2561 = vpow2.f32 %v1704_v56  ;;  %v4337_v51 = vmul.f32 %v2540_v53, %v5162_v26  ;;  %v980_v17 = vadd.f32 %v5164_v54, %v3909_v31  ;;  %v4341_v62 = vmul.f32 %v2542_v15, %v970_v36  ;;  %v2546_v28 = vpop.eup %2545  ;;  %v5171_v31 = vld [vmem:[#allocation17_spill] sm:$0xff]  ;;  %v5172_v36 = vld [vmem:[#allocation51_spill] sm:$0xff] }
 0x397   : > { %5161 = vst [vmem:[#allocation70_spill] sm:$0xff] %v4333_v57  ;;  %2563 = vpow2.f32 %v1708_v59  ;;  %v1756_v50 = vadd.f32 %v2522_v20, %v1755_v61  ;;  %v1736_v5 = vadd.f32 %v4139_v46, %v1735_v2  ;;  %v4345_v47 = vmul.f32 %v2544_v29, %v5166_v32  ;;  %v2548_v16 = vpop.eup %2547  ;;  %v5174_v2 = vld [vmem:[#allocation19_spill] sm:$0xff] }
 0x398   : > { %5163 = vst [vmem:[#allocation32_spill] sm:$0xff] %v4337_v51  ;;  %5165 = vst [vmem:[#allocation72_spill] sm:$0xff] %v4341_v62  ;;  %v990_v56 = vadd.f32 %v5168_v40, %v3947_v58  ;;  %v4349_v34 = vmul.f32 %v2546_v28, %v980_v17  ;;  %v5170_v51 = vld [vmem:[#allocation107_spill] sm:$0xff]  ;;  %v4355_v61 = vmul.f32 %v2548_v16, %v5172_v36  ;;  %v5177_v17 = vld [vmem:[#allocation21_spill] sm:$0xff] }
 0x399   : > { %5167 = vst [vmem:[#allocation74_spill] sm:$0xff] %v4345_v47  ;;  %v1757_v12 = vadd.f32 %v2524_v0, %v1756_v50  ;;  %v2550_v26 = vpop.eup %2549  ;;  %v994_v59 = vadd.f32 %v5171_v31, %v5170_v51  ;;  %v1737_v20 = vadd.f32 %v4149_v14, %v1736_v5  ;;  %v1000_v54 = vadd.f32 %v5174_v2, %v4000_v33  ;;  %v5176_v0 = vld [vmem:[#allocation63_spill] sm:$0xff] }
 0x39a   : > { %5169 = vst [vmem:[#allocation76_spill] sm:$0xff] %v4349_v34  ;;  %5173 = vst [vmem:[#allocation34_spill] sm:$0xff] %v4355_v61  ;;  %v2552_v46 = vpop.eup %2551  ;;  %v4359_v47 = vmul.f32 %v2550_v26, %v990_v56  ;;  %v1004_v50 = vadd.f32 %v5177_v17, %v5176_v0  ;;  %v5179_v14 = vld [vmem:[#allocation23_spill] sm:$0xff]  ;;  %v5182_v56 = vld [vmem:[#allocation25_spill] sm:$0xff] }
 0x39b   : > { %v1758_v32 = vadd.f32 %v2526_v21, %v1757_v12  ;;  %v2554_v58 = vpop.eup %2553  ;;  %v1738_v40 = vadd.f32 %v4159_v18, %v1737_v20  ;;  %v4364_v34 = vmul.f32 %v2552_v46, %v994_v59  ;;  %v1010_v5 = vadd.f32 %v5179_v14, %v4068_v23  ;;  %v5181_v21 = vld [vmem:[#allocation95_spill] sm:$0xff]  ;;  %v5213_v61 = vld [vmem:[#allocation58_spill] sm:$0xff] }
 0x39c   : > { %5175 = vst [vmem:[#allocation78_spill] sm:$0xff] %v4359_v47  ;;  %v2556_v51 = vpop.eup %2555  ;;  %v4369_v36 = vmul.f32 %v2554_v58, %v1000_v54  ;;  %v1014_v12 = vadd.f32 %v5182_v56, %v5181_v21  ;;  %v5184_v18 = vld [vmem:[#allocation27_spill] sm:$0xff] }
 0x39d   : > { %5178 = vst [vmem:[#allocation80_spill] sm:$0xff] %v4364_v34  ;;  %v1759_v31 = vadd.f32 %v4279_v48, %v1758_v32  ;;  %v1739_v2 = vadd.f32 %v4169_v4, %v1738_v40  ;;  %v4374_v47 = vmul.f32 %v2556_v51, %v1004_v50  ;;  %v1020_v59 = vadd.f32 %v5184_v18, %v4129_v10  ;;  %v5186_v48 = vld [vmem:[#allocation29_spill] sm:$0xff] }
 0x39e   : > { %5180 = vst [vmem:[#allocation82_spill] sm:$0xff] %v4369_v36  ;;  %v2558_v33 = vpop.eup %2557  ;;  %v1024_v54 = vadd.f32 %v5186_v48, %v4066_v52  ;;  %v5212_v36 = vld [vmem:[#allocation57_spill] sm:$0xff] }
 0x39f   : > { %5183 = vst [vmem:[#allocation37_spill] sm:$0xff] %v4374_v47  ;;  %v2560_v0 = vpop.eup %2559  ;;  %v1760_v20 = vadd.f32 %v4287_v8, %v1759_v31  ;;  %v4379_v17 = vmul.f32 %v2558_v33, %v1010_v5  ;;  %v1740_v32 = vadd.f32 %v4178_v37, %v1739_v2 }
 0x3a0   : > { %v2562_v23 = vpop.eup %2561  ;;  %v4384_v14 = vmul.f32 %v2560_v0, %v1014_v12 }
 0x3a1   : > { %5185 = vst [vmem:[#allocation84_spill] sm:$0xff] %v4379_v17  ;;  %v2564_v21 = vpop.eup %2563  ;;  %v1761_v4 = vadd.f32 %v4297_v49, %v1760_v20  ;;  %v4387_v50 = vmul.f32 %v2562_v23, %v1020_v59  ;;  %v1741_v40 = vrot.slane %v1740_v32, 4 }
 0x3a2   : > { %5187 = vst [vmem:[#allocation86_spill] sm:$0xff] %v4384_v14  ;;  %v4389_v56 = vmul.f32 %v2564_v21, %v1024_v54 }
 0x3a3   : > { %5188 = vst [vmem:[#allocation88_spill] sm:$0xff] %v4387_v50  ;;  %v1762_v10 = vadd.f32 %v4306_v7, %v1761_v4  ;;  %v1742_v8 = vadd.f32 %v1741_v40, %v1740_v32  ;;  %v4393_v7 = vstv %s1786_s5  ;;  %v5189_v32 = vld [vmem:[#allocation69_spill] sm:$0xff]  ;;  %v5190_v4 = vld [vmem:[#allocation71_spill] sm:$0xff] }
 0x3a4   : > { %v5191_v40 = vld [vmem:[#allocation73_spill] sm:$0xff] }
 0x3a5   : > { %v1763_v5 = vadd.f32 %v4316_v35, %v1762_v10  ;;  %v1743_v31 = vrot.slane %v1742_v8, 2  ;;  %v5192_v10 = vld [vmem:[#allocation75_spill] sm:$0xff] }
 0x3a7   : > { %v1764_v18 = vadd.f32 %v2538_v55, %v1763_v5  ;;  %v1744_v52 = vadd.f32 %v1743_v31, %v1742_v8  ;;  %v5195_v5 = vld [vmem:[#allocation81_spill] sm:$0xff]  ;;  %v5196_v31 = vld [vmem:[#allocation83_spill] sm:$0xff] }
 0x3a9   : > { %v1765_v48 = vadd.f32 %v2540_v53, %v1764_v18  ;;  %v1745_v37 = vrot.slane %v1744_v52, 1 }
 0x3ab   : > { %v1766_v12 = vadd.f32 %v2542_v15, %v1765_v48  ;;  %v1746_v2 = vadd.f32 %v1745_v37, %v1744_v52  ;;  %v5198_v52 = vld [vmem:[#allocation87_spill] sm:$0xff]  ;;  %v5199_v37 = vld [vmem:[#allocation89_spill] sm:$0xff] }
 0x3ad   : > { %v1767_v14 = vadd.f32 %v2544_v29, %v1766_v12  ;;  %2565 = vrcp.f32 %v1746_v2  ;;  %v5200_v2 = vld [vmem:[#allocation91_spill] sm:$0xff] }
 0x3af   : > { %v1768_v49 = vadd.f32 %v2546_v28, %v1767_v14  ;;  %v5193_v14 = vld [vmem:[#allocation77_spill] sm:$0xff] }
 0x3b1   : > { %v1769_v59 = vadd.f32 %v2548_v16, %v1768_v49 }
 0x3b3   : > { %v1770_v20 = vadd.f32 %v2550_v26, %v1769_v59  ;;  %v5194_v26 = vld [vmem:[#allocation79_spill] sm:$0xff] }
 0x3b4   : > { %v2569_v59 = vld [vmem:[%s2877_s16 + $0x1f0] sm:$0xff] }
 0x3b5   : > { %v1771_v54 = vadd.f32 %v2552_v46, %v1770_v20 }
 0x3b7   : > { %v1772_v50 = vadd.f32 %v2554_v58, %v1771_v54  ;;  %v2566_v17 = vpop.eup %2565 }
 0x3b8   : > { %v1913_v35 = vmul.f32 %v2566_v17, %v4192_v30  ;;  %v1851_v53 = vmul.f32 %v2566_v17, %v5189_v32  ;;  %v1853_v15 = vmul.f32 %v2566_v17, %v5190_v4  ;;  %v1855_v29 = vmul.f32 %v2566_v17, %v5191_v40  ;;  %v5201_v32 = vld [vmem:[#allocation93_spill] sm:$0xff] }
 0x3b9   : > { %v1773_v55 = vadd.f32 %v2556_v51, %v1772_v50  ;;  %v1857_v28 = vmul.f32 %v2566_v17, %v5192_v10  ;;  %v1859_v16 = vmul.f32 %v2566_v17, %v5193_v14  ;;  %v1861_v46 = vmul.f32 %v2566_v17, %v5194_v26  ;;  %v5197_v50 = vld [vmem:[#allocation85_spill] sm:$0xff]  ;;  %v5205_v26 = vld [vmem:[#allocation103_spill] sm:$0xff] }
 0x3ba   : > { %v1978_v58 = vmul.f32 %v4393_v7, %v1913_v35  ;;  %v1863_v30 = vmul.f32 %v2566_v17, %v5195_v5  ;;  %v1865_v51 = vmul.f32 %v2566_v17, %v5196_v31  ;;  %v1867_v18 = vmul.f32 %v2566_v17, %v5197_v50  ;;  %v5202_v35 = vld [vmem:[#allocation97_spill] sm:$0xff]  ;;  %v5206_v31 = vld [vmem:[#allocation11_spill] sm:$0xff] }
 0x3bb   : > { %v1774_v8 = vadd.f32 %v2558_v33, %v1773_v55  ;;  %v1869_v48 = vmul.f32 %v2566_v17, %v5198_v52  ;;  %v1871_v12 = vmul.f32 %v2566_v17, %v5199_v37  ;;  %v1873_v49 = vmul.f32 %v2566_v17, %v5200_v2  ;;  %v5203_v55 = vld [vmem:[#allocation99_spill] sm:$0xff]  ;;  %v5204_v10 = vld [vmem:[#allocation101_spill] sm:$0xff]  ;;  %v5209_v2 = vld [vmem:[#allocation54_spill] sm:$0xff] }
 0x3bc   : > { %v2042_v20 = vadd.f32 %v2569_v59, %v1978_v58  ;;  %v1875_v4 = vmul.f32 %v2566_v17, %v5201_v32  ;;  %v1877_v33 = vmul.f32 %v2566_v17, %v5202_v35  ;;  %v1879_v40 = vmul.f32 %v2566_v17, %v5203_v55  ;;  %v5207_v58 = vld [vmem:[#allocation20_spill] sm:$0xff]  ;;  %v5210_v35 = vld [vmem:[#allocation55_spill] sm:$0xff] }
 0x3bd   : > { %v1775_v54 = vadd.f32 %v2560_v0, %v1774_v8  ;;  %v1881_v14 = vmul.f32 %v2566_v17, %v5204_v10  ;;  %v1883_v5 = vmul.f32 %v2566_v17, %v5205_v26  ;;  %v1885_v50 = vmul.f32 %v2566_v17, %v5206_v31  ;;  %v5208_v8 = vld [vmem:[#allocation53_spill] sm:$0xff]  ;;  %v5211_v26 = vld [vmem:[#allocation56_spill] sm:$0xff] }
 0x3be   : > { %2106 = vst [vmem:[%s4418_s6 + $0x1f0] sm:$0xff] %v2042_v20  ;;  %v1887_v0 = vmul.f32 %v2566_v17, %v5207_v58  ;;  %v1889_v37 = vmul.f32 %v2566_v17, %v5208_v8  ;;  %v1891_v59 = vmul.f32 %v2566_v17, %v5209_v2  ;;  %v1893_v32 = vmul.f32 %v2566_v17, %v4092_v43  ;;  %v5215_v58 = vld [vmem:[#allocation60_spill] sm:$0xff]  ;;  %v5216_v8 = vld [vmem:[#allocation62_spill] sm:$0xff] }
 0x3bf   : > { %v1776_v52 = vadd.f32 %v2562_v23, %v1775_v54  ;;  %v1895_v55 = vmul.f32 %v2566_v17, %v5210_v35  ;;  %v1897_v10 = vmul.f32 %v2566_v17, %v4112_v11  ;;  %v1899_v31 = vmul.f32 %v2566_v17, %v5211_v26  ;;  %v5214_v23 = vld [vmem:[#allocation59_spill] sm:$0xff]  ;;  %v5217_v2 = vld [vmem:[#allocation64_spill] sm:$0xff] }
 0x3c0   : > { %v1901_v34 = vmul.f32 %v2566_v17, %v5212_v36  ;;  %v1903_v20 = vmul.f32 %v2566_v17, %v5213_v61  ;;  %v1905_v54 = vmul.f32 %v2566_v17, %v5214_v23  ;;  %v1907_v62 = vmul.f32 %v2566_v17, %v5215_v58 }
 0x3c1   : > { %v1777_v47 = vadd.f32 %v2564_v21, %v1776_v52  ;;  %v1909_v57 = vmul.f32 %v2566_v17, %v5216_v8  ;;  %v1911_v9 = vmul.f32 %v2566_v17, %v5217_v2  ;;  %v1916_v43 = vmul.f32 %v4393_v7, %v1851_v53 }
 0x3c2   : > { %v1918_v11 = vmul.f32 %v4393_v7, %v1853_v15  ;;  %v1920_v26 = vmul.f32 %v4393_v7, %v1855_v29  ;;  %v1922_v21 = vmul.f32 %v4393_v7, %v1857_v28  ;;  %v1924_v36 = vmul.f32 %v4393_v7, %v1859_v16 }
 0x3c3   : > { %v1778_v35 = vrot.slane %v1777_v47, 4  ;;  %v1926_v61 = vmul.f32 %v4393_v7, %v1861_v46  ;;  %v1928_v52 = vmul.f32 %v4393_v7, %v1863_v30  ;;  %v1930_v23 = vmul.f32 %v4393_v7, %v1865_v51 }
 0x3c4   : > { %v1932_v17 = vmul.f32 %v4393_v7, %v1867_v18  ;;  %v1934_v53 = vmul.f32 %v4393_v7, %v1869_v48  ;;  %v1936_v8 = vmul.f32 %v4393_v7, %v1871_v12  ;;  %v1938_v15 = vmul.f32 %v4393_v7, %v1873_v49 }
 0x3c5   : > { %v1779_v58 = vadd.f32 %v1778_v35, %v1777_v47  ;;  %v1940_v29 = vmul.f32 %v4393_v7, %v1875_v4  ;;  %v1942_v28 = vmul.f32 %v4393_v7, %v1877_v33  ;;  %v1944_v16 = vmul.f32 %v4393_v7, %v1879_v40 }
 0x3c6   : > { %v1946_v30 = vmul.f32 %v4393_v7, %v1881_v14  ;;  %v1948_v51 = vmul.f32 %v4393_v7, %v1883_v5  ;;  %v1950_v47 = vmul.f32 %v4393_v7, %v1885_v50  ;;  %v1952_v18 = vmul.f32 %v4393_v7, %v1887_v0 }
 0x3c7   : > { %v1780_v46 = vrot.slane %v1779_v58, 2  ;;  %v4454_v48 = vmul.f32 %v4393_v7, %v1889_v37  ;;  %v4457_v12 = vmul.f32 %v4393_v7, %v1891_v59  ;;  %v4460_v49 = vmul.f32 %v4393_v7, %v1893_v32 }
 0x3c8   : > { %v4463_v33 = vmul.f32 %v4393_v7, %v1895_v55  ;;  %v4466_v40 = vmul.f32 %v4393_v7, %v1897_v10  ;;  %v4469_v14 = vmul.f32 %v4393_v7, %v1899_v31  ;;  %v4472_v5 = vmul.f32 %v4393_v7, %v1901_v34  ;;  %v2570_v34 = vld [vmem:[%s2877_s16] sm:$0xff]  ;;  %v2571_v31 = vld [vmem:[%s2877_s16 + $0x10] sm:$0xff] }
 0x3c9   : > { %v1781_v4 = vadd.f32 %v1780_v46, %v1779_v58  ;;  %v4475_v50 = vmul.f32 %v4393_v7, %v1903_v20  ;;  %v4478_v0 = vmul.f32 %v4393_v7, %v1905_v54  ;;  %v4481_v37 = vmul.f32 %v4393_v7, %v1907_v62  ;;  %v2572_v54 = vld [vmem:[%s2877_s16 + $0x20] sm:$0xff]  ;;  %v2573_v62 = vld [vmem:[%s2877_s16 + $0x30] sm:$0xff] }
 0x3ca   : > { %v4484_v32 = vmul.f32 %v4393_v7, %v1909_v57  ;;  %v4487_v55 = vmul.f32 %v4393_v7, %v1911_v9  ;;  %v1980_v10 = vadd.f32 %v2570_v34, %v1916_v43  ;;  %v1982_v20 = vadd.f32 %v2571_v31, %v1918_v11  ;;  %v2574_v58 = vld [vmem:[%s2877_s16 + $0x40] sm:$0xff]  ;;  %v2575_v9 = vld [vmem:[%s2877_s16 + $0x50] sm:$0xff] }
 0x3cb   : > { %v1782_v59 = vrot.slane %v1781_v4, 1  ;;  %v1984_v2 = vadd.f32 %v2572_v54, %v1920_v26  ;;  %v1986_v35 = vadd.f32 %v2573_v62, %v1922_v21  ;;  %v1988_v57 = vadd.f32 %v2574_v58, %v1924_v36  ;;  %v2576_v43 = vld [vmem:[%s2877_s16 + $0x60] sm:$0xff]  ;;  %v2579_v21 = vld [vmem:[%s2877_s16 + $0x90] sm:$0xff] }
 0x3cc   : > { %v1990_v24 = vadd.f32 %v2575_v9, %v1926_v61  ;;  %v1992_v34 = vadd.f32 %v2576_v43, %v1928_v52  ;;  %v1994_v11 = vadd.f32 %v2577_v22, %v1930_v23  ;;  %2044 = vst [vmem:[%s4418_s6] sm:$0xff] %v1980_v10  ;;  %v2578_v26 = vld [vmem:[%s2877_s16 + $0x80] sm:$0xff]  ;;  %v1998_v54 = vadd.f32 %v2579_v21, %v1934_v53  ;;  %v2581_v61 = vld [vmem:[%s2877_s16 + $0xb0] sm:$0xff] }
 0x3cd   : > { %v1783_v46 = vadd.f32 %v1782_v59, %v1781_v4  ;;  %v1996_v31 = vadd.f32 %v2578_v26, %v1932_v17  ;;  %v2580_v36 = vld [vmem:[%s2877_s16 + $0xa0] sm:$0xff]  ;;  %v2002_v59 = vadd.f32 %v2581_v61, %v1938_v15  ;;  %2046 = vst [vmem:[%s4418_s6 + $0x10] sm:$0xff] %v1982_v20  ;;  %2048 = vst [vmem:[%s4418_s6 + $0x20] sm:$0xff] %v1984_v2  ;;  %v2583_v23 = vld [vmem:[%s2877_s16 + $0xd0] sm:$0xff] }
 0x3ce   : > { %v2000_v4 = vadd.f32 %v2580_v36, %v1936_v8  ;;  %2050 = vst [vmem:[%s4418_s6 + $0x30] sm:$0xff] %v1986_v35  ;;  %2052 = vst [vmem:[%s4418_s6 + $0x40] sm:$0xff] %v1988_v57  ;;  %v2582_v22 = vld [vmem:[%s2877_s16 + $0xc0] sm:$0xff]  ;;  %v2006_v17 = vadd.f32 %v2583_v23, %v1942_v28  ;;  %v2585_v15 = vld [vmem:[%s2877_s16 + $0xf0] sm:$0xff] }
 0x3cf   : > { %2567 = vrcp.f32 %v1783_v46  ;;  %v2004_v52 = vadd.f32 %v2582_v22, %v1940_v29  ;;  %v2584_v53 = vld [vmem:[%s2877_s16 + $0xe0] sm:$0xff]  ;;  %2054 = vst [vmem:[%s4418_s6 + $0x50] sm:$0xff] %v1990_v24  ;;  %2056 = vst [vmem:[%s4418_s6 + $0x60] sm:$0xff] %v1992_v34  ;;  %v2010_v10 = vadd.f32 %v2585_v15, %v1946_v30  ;;  %v2587_v29 = vld [vmem:[%s2877_s16 + $0x110] sm:$0xff] }
 0x3d0   : > { %v2008_v8 = vadd.f32 %v2584_v53, %v1944_v16  ;;  %2058 = vst [vmem:[%s4418_s6 + $0x70] sm:$0xff] %v1994_v11  ;;  %v2586_v20 = vld [vmem:[%s2877_s16 + $0x100] sm:$0xff]  ;;  %v2014_v62 = vadd.f32 %v2587_v29, %v1950_v47  ;;  %2060 = vst [vmem:[%s4418_s6 + $0x80] sm:$0xff] %v1996_v31  ;;  %v2589_v24 = vld [vmem:[%s2877_s16 + $0x130] sm:$0xff] }
 0x3d1   : > { %v2012_v2 = vadd.f32 %v2586_v20, %v1948_v51  ;;  %v2588_v28 = vld [vmem:[%s2877_s16 + $0x120] sm:$0xff]  ;;  %2062 = vst [vmem:[%s4418_s6 + $0x90] sm:$0xff] %v1998_v54  ;;  %2064 = vst [vmem:[%s4418_s6 + $0xa0] sm:$0xff] %v2000_v4  ;;  %v2018_v16 = vadd.f32 %v2589_v24, %v4454_v48  ;;  %v2591_v47 = vld [vmem:[%s2877_s16 + $0x150] sm:$0xff] }
 0x3d2   : > { %v2016_v35 = vadd.f32 %v2588_v28, %v1952_v18  ;;  %2066 = vst [vmem:[%s4418_s6 + $0xb0] sm:$0xff] %v2002_v59  ;;  %v2590_v30 = vld [vmem:[%s2877_s16 + $0x140] sm:$0xff]  ;;  %v2022_v58 = vadd.f32 %v2591_v47, %v4460_v49  ;;  %2068 = vst [vmem:[%s4418_s6 + $0xc0] sm:$0xff] %v2004_v52  ;;  %v2593_v48 = vld [vmem:[%s2877_s16 + $0x170] sm:$0xff] }
 0x3d3   : > { %v2020_v51 = vadd.f32 %v2590_v30, %v4457_v12  ;;  %v2592_v18 = vld [vmem:[%s2877_s16 + $0x160] sm:$0xff]  ;;  %2070 = vst [vmem:[%s4418_s6 + $0xd0] sm:$0xff] %v2006_v17  ;;  %2072 = vst [vmem:[%s4418_s6 + $0xe0] sm:$0xff] %v2008_v8  ;;  %v2026_v46 = vadd.f32 %v2593_v48, %v4466_v40  ;;  %v2595_v43 = vld [vmem:[%s2877_s16 + $0x190] sm:$0xff] }
 0x3d4   : > { %v2024_v57 = vadd.f32 %v2592_v18, %v4463_v33  ;;  %v2594_v12 = vld [vmem:[%s2877_s16 + $0x180] sm:$0xff]  ;;  %v2030_v49 = vadd.f32 %v2595_v43, %v4472_v5  ;;  %2074 = vst [vmem:[%s4418_s6 + $0xf0] sm:$0xff] %v2010_v10  ;;  %2076 = vst [vmem:[%s4418_s6 + $0x100] sm:$0xff] %v2012_v2  ;;  %v2597_v40 = vld [vmem:[%s2877_s16 + $0x1b0] sm:$0xff] }
 0x3d5   : > { %v2028_v9 = vadd.f32 %v2594_v12, %v4469_v14  ;;  %v2596_v34 = vld [vmem:[%s2877_s16 + $0x1a0] sm:$0xff]  ;;  %2078 = vst [vmem:[%s4418_s6 + $0x110] sm:$0xff] %v2014_v62  ;;  %2080 = vst [vmem:[%s4418_s6 + $0x120] sm:$0xff] %v2016_v35  ;;  %v2034_v14 = vadd.f32 %v2597_v40, %v4478_v0  ;;  %v5218_v17 = vld [vmem:[#allocation30_spill] sm:$0xff] }
 0x3d6   : > { %v2032_v33 = vadd.f32 %v2596_v34, %v4475_v50  ;;  %v2598_v5 = vld [vmem:[%s2877_s16 + $0x1c0] sm:$0xff]  ;;  %v2599_v50 = vld [vmem:[%s2877_s16 + $0x1d0] sm:$0xff]  ;;  %2082 = vst [vmem:[%s4418_s6 + $0x130] sm:$0xff] %v2018_v16  ;;  %2084 = vst [vmem:[%s4418_s6 + $0x140] sm:$0xff] %v2020_v51 }
 0x3d7   : > { %v2036_v11 = vadd.f32 %v2598_v5, %v4481_v37  ;;  %v2038_v26 = vadd.f32 %v2599_v50, %v4484_v32  ;;  %v2600_v31 = vld [vmem:[%s2877_s16 + $0x1e0] sm:$0xff]  ;;  %2086 = vst [vmem:[%s4418_s6 + $0x150] sm:$0xff] %v2022_v58  ;;  %2088 = vst [vmem:[%s4418_s6 + $0x160] sm:$0xff] %v2024_v57  ;;  %v5220_v15 = vld [vmem:[#allocation68_spill] sm:$0xff] }
 0x3d8   : > { %v2040_v21 = vadd.f32 %v2600_v31, %v4487_v55  ;;  %2090 = vst [vmem:[%s4418_s6 + $0x170] sm:$0xff] %v2026_v46  ;;  %2092 = vst [vmem:[%s4418_s6 + $0x180] sm:$0xff] %v2028_v9  ;;  %v5221_v10 = vld [vmem:[#allocation70_spill] sm:$0xff]  ;;  %v5222_v20 = vld [vmem:[#allocation32_spill] sm:$0xff] }
 0x3d9   : > { %2094 = vst [vmem:[%s4418_s6 + $0x190] sm:$0xff] %v2030_v49  ;;  %2096 = vst [vmem:[%s4418_s6 + $0x1a0] sm:$0xff] %v2032_v33  ;;  %v2568_v0 = vpop.eup %2567  ;;  %v5223_v2 = vld [vmem:[#allocation72_spill] sm:$0xff]  ;;  %v5226_v28 = vld [vmem:[#allocation34_spill] sm:$0xff] }
 0x3da   : > { %2098 = vst [vmem:[%s4418_s6 + $0x1b0] sm:$0xff] %v2034_v14  ;;  %2100 = vst [vmem:[%s4418_s6 + $0x1c0] sm:$0xff] %v2036_v11  ;;  %v1914_v37 = vmul.f32 %v2568_v0, %v4389_v56  ;;  %v1852_v32 = vmul.f32 %v2568_v0, %v4222_v19  ;;  %v1854_v55 = vmul.f32 %v2568_v0, %v4225_v1  ;;  %v5228_v16 = vld [vmem:[#allocation80_spill] sm:$0xff]  ;;  %v5229_v51 = vld [vmem:[#allocation82_spill] sm:$0xff] }
 0x3db   : > { %2102 = vst [vmem:[%s4418_s6 + $0x1d0] sm:$0xff] %v2038_v26  ;;  %2104 = vst [vmem:[%s4418_s6 + $0x1e0] sm:$0xff] %v2040_v21  ;;  %v1856_v54 = vmul.f32 %v2568_v0, %v4228_v63  ;;  %v1858_v36 = vmul.f32 %v2568_v0, %v4231_v38  ;;  %v1860_v4 = vmul.f32 %v2568_v0, %v4235_v13  ;;  %v5230_v58 = vld [vmem:[#allocation37_spill] sm:$0xff]  ;;  %v5231_v57 = vld [vmem:[#allocation84_spill] sm:$0xff] }
 0x3dc   : > { %v1862_v61 = vmul.f32 %v2568_v0, %v4238_v41  ;;  %v1864_v59 = vmul.f32 %v2568_v0, %v4244_v45  ;;  %v1979_v22 = vmul.f32 %v4393_v7, %v1914_v37  ;;  %v1866_v52 = vmul.f32 %v2568_v0, %v4251_v27  ;;  %v2601_v41 = vld [vmem:[%s2877_s16 + $0x1f8] sm:$0xff]  ;;  %v5219_v27 = vld [vmem:[#allocation66_spill] sm:$0xff] }
 0x3dd   : > { %v1868_v56 = vmul.f32 %v2568_v0, %v4257_v60  ;;  %v1870_v19 = vmul.f32 %v2568_v0, %v4264_v39  ;;  %v1872_v1 = vmul.f32 %v2568_v0, %v4270_v42  ;;  %v1874_v63 = vmul.f32 %v2568_v0, %v4277_v44  ;;  %v5232_v46 = vld [vmem:[#allocation86_spill] sm:$0xff]  ;;  %v5233_v9 = vld [vmem:[#allocation88_spill] sm:$0xff] }
 0x3de   : > { %v1876_v38 = vmul.f32 %v2568_v0, %v4285_v6  ;;  %v1878_v13 = vmul.f32 %v2568_v0, %v4295_v3  ;;  %v2043_v23 = vadd.f32 %v2601_v41, %v1979_v22  ;;  %v1880_v45 = vmul.f32 %v2568_v0, %v4304_v25  ;;  %v5224_v6 = vld [vmem:[#allocation74_spill] sm:$0xff]  ;;  %v5225_v3 = vld [vmem:[#allocation76_spill] sm:$0xff] }
 0x3df   : > { %v1882_v53 = vmul.f32 %v2568_v0, %v5218_v17  ;;  %v1884_v8 = vmul.f32 %v2568_v0, %v5219_v27  ;;  %v1886_v60 = vmul.f32 %v2568_v0, %v5220_v15  ;;  %v1888_v39 = vmul.f32 %v2568_v0, %v5221_v10  ;;  %v5227_v25 = vld [vmem:[#allocation78_spill] sm:$0xff]  ;;  %v2603_v27 = vld [vmem:[%s2877_s16 + $0x18] sm:$0xff] }
 0x3e0   : > { %v1890_v42 = vmul.f32 %v2568_v0, %v5222_v20  ;;  %v1892_v44 = vmul.f32 %v2568_v0, %v5223_v2  ;;  %2107 = vst [vmem:[%s4418_s6 + $0x1f8] sm:$0xff] %v2043_v23  ;;  %v1894_v29 = vmul.f32 %v2568_v0, %v5224_v6  ;;  %v1896_v62 = vmul.f32 %v2568_v0, %v5225_v3  ;;  %v2602_v17 = vld [vmem:[%s2877_s16 + $0x8] sm:$0xff]  ;;  %v2605_v10 = vld [vmem:[%s2877_s16 + $0x38] sm:$0xff] }
 0x3e1   : > { %v1898_v35 = vmul.f32 %v2568_v0, %v5226_v28  ;;  %v1900_v24 = vmul.f32 %v2568_v0, %v5227_v25  ;;  %v1902_v30 = vmul.f32 %v2568_v0, %v5228_v16  ;;  %v1904_v47 = vmul.f32 %v2568_v0, %v5229_v51  ;;  %v2604_v15 = vld [vmem:[%s2877_s16 + $0x28] sm:$0xff]  ;;  %v2607_v2 = vld [vmem:[%s2877_s16 + $0x58] sm:$0xff] }
 0x3e2   : > { %v1906_v18 = vmul.f32 %v2568_v0, %v5230_v58  ;;  %v1908_v48 = vmul.f32 %v2568_v0, %v5231_v57  ;;  %v1910_v12 = vmul.f32 %v2568_v0, %v5232_v46  ;;  %v1912_v43 = vmul.f32 %v2568_v0, %v5233_v9  ;;  %v2606_v20 = vld [vmem:[%s2877_s16 + $0x48] sm:$0xff] }
 0x3e3   : > { %v1917_v49 = vmul.f32 %v4393_v7, %v1852_v32  ;;  %v1919_v34 = vmul.f32 %v4393_v7, %v1854_v55  ;;  %v1921_v33 = vmul.f32 %v4393_v7, %v1856_v54  ;;  %v1923_v40 = vmul.f32 %v4393_v7, %v1858_v36 }
 0x3e4   : > { %v1925_v14 = vmul.f32 %v4393_v7, %v1860_v4  ;;  %v1927_v5 = vmul.f32 %v4393_v7, %v1862_v61  ;;  %v1929_v11 = vmul.f32 %v4393_v7, %v1864_v59  ;;  %v1931_v50 = vmul.f32 %v4393_v7, %v1866_v52 }
 0x3e5   : > { %v1933_v26 = vmul.f32 %v4393_v7, %v1868_v56  ;;  %v1935_v31 = vmul.f32 %v4393_v7, %v1870_v19  ;;  %v1937_v21 = vmul.f32 %v4393_v7, %v1872_v1  ;;  %v1939_v0 = vmul.f32 %v4393_v7, %v1874_v63 }
 0x3e6   : > { %v1941_v37 = vmul.f32 %v4393_v7, %v1876_v38  ;;  %v1943_v32 = vmul.f32 %v4393_v7, %v1878_v13  ;;  %v1945_v55 = vmul.f32 %v4393_v7, %v1880_v45  ;;  %v1947_v54 = vmul.f32 %v4393_v7, %v1882_v53 }
 0x3e7   : > { %v1949_v36 = vmul.f32 %v4393_v7, %v1884_v8  ;;  %v1951_v4 = vmul.f32 %v4393_v7, %v1886_v60  ;;  %v1953_v61 = vmul.f32 %v4393_v7, %v1888_v39  ;;  %v4618_v59 = vmul.f32 %v4393_v7, %v1890_v42 }
 0x3e8   : > { %v4621_v22 = vmul.f32 %v4393_v7, %v1892_v44  ;;  %v4624_v52 = vmul.f32 %v4393_v7, %v1894_v29  ;;  %v4627_v56 = vmul.f32 %v4393_v7, %v1896_v62  ;;  %v4630_v19 = vmul.f32 %v4393_v7, %v1898_v35  ;;  %v2608_v44 = vld [vmem:[%s2877_s16 + $0x68] sm:$0xff]  ;;  %v2609_v29 = vld [vmem:[%s2877_s16 + $0x78] sm:$0xff] }
 0x3e9   : > { %v4633_v1 = vmul.f32 %v4393_v7, %v1900_v24  ;;  %v4636_v63 = vmul.f32 %v4393_v7, %v1902_v30  ;;  %v4639_v38 = vmul.f32 %v4393_v7, %v1904_v47  ;;  %v4642_v13 = vmul.f32 %v4393_v7, %v1906_v18  ;;  %v2610_v62 = vld [vmem:[%s2877_s16 + $0x88] sm:$0xff]  ;;  %v2611_v35 = vld [vmem:[%s2877_s16 + $0x98] sm:$0xff] }
 0x3ea   : > { %v4645_v41 = vmul.f32 %v4393_v7, %v1908_v48  ;;  %v4648_v23 = vmul.f32 %v4393_v7, %v1910_v12  ;;  %v4651_v45 = vmul.f32 %v4393_v7, %v1912_v43  ;;  %v1981_v53 = vadd.f32 %v2602_v17, %v1917_v49  ;;  %v2612_v24 = vld [vmem:[%s2877_s16 + $0xa8] sm:$0xff]  ;;  %v2613_v30 = vld [vmem:[%s2877_s16 + $0xb8] sm:$0xff] }
 0x3eb   : > { %v1983_v8 = vadd.f32 %v2603_v27, %v1919_v34  ;;  %v1985_v60 = vadd.f32 %v2604_v15, %v1921_v33  ;;  %v1987_v39 = vadd.f32 %v2605_v10, %v1923_v40  ;;  %v1989_v42 = vadd.f32 %v2606_v20, %v1925_v14  ;;  %v2614_v47 = vld [vmem:[%s2877_s16 + $0xc8] sm:$0xff]  ;;  %v2615_v18 = vld [vmem:[%s2877_s16 + $0xd8] sm:$0xff] }
 0x3ec   : > { %v1991_v7 = vadd.f32 %v2607_v2, %v1927_v5  ;;  %v1993_v6 = vadd.f32 %v2608_v44, %v1929_v11  ;;  %v1995_v3 = vadd.f32 %v2609_v29, %v1931_v50  ;;  %v1997_v28 = vadd.f32 %v2610_v62, %v1933_v26  ;;  %2045 = vst [vmem:[%s4418_s6 + $0x8] sm:$0xff] %v1981_v53  ;;  %v2616_v48 = vld [vmem:[%s2877_s16 + $0xe8] sm:$0xff]  ;;  %v2617_v12 = vld [vmem:[%s2877_s16 + $0xf8] sm:$0xff] }
 0x3ed   : > { %v1999_v25 = vadd.f32 %v2611_v35, %v1935_v31  ;;  %v2001_v16 = vadd.f32 %v2612_v24, %v1937_v21  ;;  %2047 = vst [vmem:[%s4418_s6 + $0x18] sm:$0xff] %v1983_v8  ;;  %2049 = vst [vmem:[%s4418_s6 + $0x28] sm:$0xff] %v1985_v60  ;;  %v2003_v51 = vadd.f32 %v2613_v30, %v1939_v0  ;;  %v2618_v43 = vld [vmem:[%s2877_s16 + $0x108] sm:$0xff]  ;;  %v2619_v34 = vld [vmem:[%s2877_s16 + $0x118] sm:$0xff] }
 0x3ee   : > { %v2005_v58 = vadd.f32 %v2614_v47, %v1941_v37  ;;  %v2007_v57 = vadd.f32 %v2615_v18, %v1943_v32  ;;  %v2009_v46 = vadd.f32 %v2616_v48, %v1945_v55  ;;  %2051 = vst [vmem:[%s4418_s6 + $0x38] sm:$0xff] %v1987_v39  ;;  %2053 = vst [vmem:[%s4418_s6 + $0x48] sm:$0xff] %v1989_v42  ;;  %v2620_v40 = vld [vmem:[%s2877_s16 + $0x128] sm:$0xff]  ;;  %v2621_v5 = vld [vmem:[%s2877_s16 + $0x138] sm:$0xff] }
 0x3ef   : > { %2055 = vst [vmem:[%s4418_s6 + $0x58] sm:$0xff] %v1991_v7  ;;  %2057 = vst [vmem:[%s4418_s6 + $0x68] sm:$0xff] %v1993_v6  ;;  %v2011_v9 = vadd.f32 %v2617_v12, %v1947_v54  ;;  %v2013_v49 = vadd.f32 %v2618_v43, %v1949_v36  ;;  %v2015_v33 = vadd.f32 %v2619_v34, %v1951_v4  ;;  %v2622_v50 = vld [vmem:[%s2877_s16 + $0x148] sm:$0xff]  ;;  %v2623_v31 = vld [vmem:[%s2877_s16 + $0x158] sm:$0xff] }
 0x3f0   : > { %v2017_v14 = vadd.f32 %v2620_v40, %v1953_v61  ;;  %2059 = vst [vmem:[%s4418_s6 + $0x78] sm:$0xff] %v1995_v3  ;;  %2061 = vst [vmem:[%s4418_s6 + $0x88] sm:$0xff] %v1997_v28  ;;  %v2019_v11 = vadd.f32 %v2621_v5, %v4618_v59  ;;  %v2021_v26 = vadd.f32 %v2622_v50, %v4621_v22  ;;  %v2624_v0 = vld [vmem:[%s2877_s16 + $0x168] sm:$0xff]  ;;  %v2625_v32 = vld [vmem:[%s2877_s16 + $0x178] sm:$0xff] }
 0x3f1   : > { %2063 = vst [vmem:[%s4418_s6 + $0x98] sm:$0xff] %v1999_v25  ;;  %2065 = vst [vmem:[%s4418_s6 + $0xa8] sm:$0xff] %v2001_v16  ;;  %v2023_v21 = vadd.f32 %v2623_v31, %v4624_v52  ;;  %v2025_v37 = vadd.f32 %v2624_v0, %v4627_v56  ;;  %v2027_v55 = vadd.f32 %v2625_v32, %v4630_v19  ;;  %v2626_v54 = vld [vmem:[%s2877_s16 + $0x188] sm:$0xff]  ;;  %v2627_v4 = vld [vmem:[%s2877_s16 + $0x198] sm:$0xff] }
 0x3f2   : > { %2067 = vst [vmem:[%s4418_s6 + $0xb8] sm:$0xff] %v2003_v51  ;;  %2069 = vst [vmem:[%s4418_s6 + $0xc8] sm:$0xff] %v2005_v58  ;;  %v2029_v36 = vadd.f32 %v2626_v54, %v4633_v1  ;;  %v2031_v61 = vadd.f32 %v2627_v4, %v4636_v63  ;;  %v2628_v59 = vld [vmem:[%s2877_s16 + $0x1a8] sm:$0xff]  ;;  %v2629_v52 = vld [vmem:[%s2877_s16 + $0x1b8] sm:$0xff] }
 0x3f3   : > { %2071 = vst [vmem:[%s4418_s6 + $0xd8] sm:$0xff] %v2007_v57  ;;  %2073 = vst [vmem:[%s4418_s6 + $0xe8] sm:$0xff] %v2009_v46  ;;  %v2033_v22 = vadd.f32 %v2628_v59, %v4639_v38  ;;  %v2035_v56 = vadd.f32 %v2629_v52, %v4642_v13  ;;  %v2630_v19 = vld [vmem:[%s2877_s16 + $0x1c8] sm:$0xff]  ;;  %v2631_v63 = vld [vmem:[%s2877_s16 + $0x1d8] sm:$0xff] }
 0x3f4   : > { %2075 = vst [vmem:[%s4418_s6 + $0xf8] sm:$0xff] %v2011_v9  ;;  %2077 = vst [vmem:[%s4418_s6 + $0x108] sm:$0xff] %v2013_v49  ;;  %v2037_v1 = vadd.f32 %v2630_v19, %v4645_v41  ;;  %v2039_v38 = vadd.f32 %v2631_v63, %v4648_v23  ;;  %v2632_v17 = vld [vmem:[%s2877_s16 + $0x1e8] sm:$0xff]  ;;  %s2736_s16 = smov [#allocation6]  }
 0x3f5   : > { %2079 = vst [vmem:[%s4418_s6 + $0x118] sm:$0xff] %v2015_v33  ;;  %2081 = vst [vmem:[%s4418_s6 + $0x128] sm:$0xff] %v2017_v14  ;;  %v2041_v53 = vadd.f32 %v2632_v17, %v4651_v45  ;;  %s2667_s11 = sshll.u32 %s2736_s16, 4  ;;  %s2668_s11 = int_to_ptr.vmem [resolvable:$false] %s2667_s11 }
 0x3f6   : > { %2083 = vst [vmem:[%s4418_s6 + $0x138] sm:$0xff] %v2019_v11  ;;  %2085 = vst [vmem:[%s4418_s6 + $0x148] sm:$0xff] %v2021_v26  ;;  %s2669_s12 = scalar_lea.vmem %s2668_s11, 16384  ;;  %p2670_p8 = scmp.lt.s32.totalorder %s4718_s7, %s2668_s11 }
 0x3f7   : > { %2087 = vst [vmem:[%s4418_s6 + $0x158] sm:$0xff] %v2023_v21  ;;  %2089 = vst [vmem:[%s4418_s6 + $0x168] sm:$0xff] %v2025_v37  ;;  %p2671_p10 = scmp.lt.s32.totalorder %s2669_s12, %s2663_s9 }
 0x3f8   : > { %2091 = vst [vmem:[%s4418_s6 + $0x178] sm:$0xff] %v2027_v55  ;;  %2093 = vst [vmem:[%s4418_s6 + $0x188] sm:$0xff] %v2029_v36 }
 0x3f9   : > { %2095 = vst [vmem:[%s4418_s6 + $0x198] sm:$0xff] %v2031_v61  ;;  %2097 = vst [vmem:[%s4418_s6 + $0x1a8] sm:$0xff] %v2033_v22  ;;  %p2672_p0 = por %p2671_p10, %p2670_p8 }
 0x3fa   : > { %2099 = vst [vmem:[%s4418_s6 + $0x1b8] sm:$0xff] %v2035_v56  ;;  %2101 = vst [vmem:[%s4418_s6 + $0x1c8] sm:$0xff] %v2037_v1 }
 0x3fb   : > { %2103 = vst [vmem:[%s4418_s6 + $0x1d8] sm:$0xff] %v2039_v38  ;;  %2105 = vst [vmem:[%s4418_s6 + $0x1e8] sm:$0xff] %v2041_v53  ;;  %p2673_p2 = pnand %p2672_p0, %p2666_p13 }
 0x3fd   : > { %2676 = shalt.err (!%p2673_p2)
}
 0x3fe   : > { %s2677_s13 = scalar_lea.hbm %s4714_s27, 8192  ;;  %s2681_s24 = scalar_lea.hbm %s4786_s4, 16384 }
 0x3ff   : > { %p2678_p4 = scmp.ne.s32.totalorder %s4714_s27, %s2677_s13  ;;  %p2682_p9 = scmp.lt.u32.totalorder %s4714_s27, %s4786_s4 }
 0x400   : > { %p2683_p1 = scmp.lt.u32.totalorder %s2681_s24, %s2677_s13  ;;  %p2685_p6 = scmp.lt.u32.totalorder %s2677_s13, %s4714_s27 }
 0x401   : > { %p2679_p5 = pnand %p2678_p4, %p5234_p11 }
 0x402   : > { %p2684_p3 = por %p2683_p1, %p2682_p9 }
 0x403   : > { %p2680_p7 = pneg %p2679_p5 }
 0x404   : > { %p2686_p12 = por %p2685_p6, %p2684_p3 }
 0x406   : > { %p2687_p13 = pnand %p2686_p12, %p2680_p7 }
 0x408   : > { %2690 = shalt.err (!%p2687_p13)
}
 0x409   : > { %s2737_s5 = smov 256   ;;  %s2738_s6 = smov 16  }
 0x40a   : > { %2325 = dma.vmem_to_hbm [thread:$0]  (%p5234_p11), %s4718_s7, 8192, %s4714_s27, %s2109_s3, %s2737_s5, %s2737_s5, %s2738_s6  }
 0x40b PF: > { %s2137_s14 = sand.u32 1, %s2717_s17   ;;  %p5235_p8 = scmp.ne.s32.totalorder %s4882_s29, 0 }
 0x40c   : > { %p5236_p10 = scmp.ge.s32.totalorder %s2729_s20, 2  ;;  %s2138_s8 = scalar_lea.sflag [#allocation5], %s2137_s14 }
 0x40e   : > { %p2332_p0 = pnand %p5236_p10, %p5235_p8 }
 0x410   : > { %2712 = dma.done.wait (!%p2332_p0), %s2138_s8, 8192  }
 0x411   : > { %2714 = vsyncadd (!%p2332_p0), %s2138_s8, 4294959104  ;;  %p18_p2 = scmp.ge.s32.totalorder %s2792_s22, 4   ;;  %s5237_s17 = smov %s2721_s18 }
 0x412   : > { %s5238_s18 = smov %s2725_s19  ;;  %s5239_s19 = smov %s2804_s25 }
 0x413   : > { %s5240_s20 = smov %s2792_s22  ;;  %20 = sbr.rel (!%p18_p2) target bundleno = 7 (0x7), region = 81 }
 0x41a   :  { %2143 = vsyncpa [#allocation4], 1 }
 0x41b   :  { %2145 = vsyncpa [#allocation4 + $0x1], 1 }
 0x41c   :  { %2146 = vsyncpa [#allocation5], 1 }
 0x41d   :  { %2148 = vsyncpa [#allocation5 + $0x1], 1 }

</bundles_post_ra>
